<compile_context>
chip_gen: v7x
topology: tpu7x:2x2x1
jax: 0.10.0
libtpu: 0.0.40
codegen_flags: <defaults>
</compile_context>

<pallas_src>
import functools

import jax
import jax.numpy as jnp
import numpy as np
from jax.experimental import pallas as pl
from jax.experimental.pallas import tpu as pltpu


# ----------------------------- Pallas kernels ------------------------------ #

def _upconv_kernel(x_ref, w_ref, b_ref, o_ref):
    """ConvTranspose2d(k=2, s=2) as a single fused channel matmul.

    x_ref: (1, C, h*w)    one batch element, spatial flattened on lanes
    w_ref: (4*C, C)       rows ordered (ki, kj, co), cols ci
    b_ref: (4*C, 1)       bias replicated per (ki, kj) block
    o_ref: (1, 4*C, h*w)  k-blocked output (spatially de-interleaved by caller)
    """
    y = jnp.dot(w_ref[...], x_ref[0], preferred_element_type=jnp.float32)
    o_ref[0] = (y + b_ref[...]).astype(o_ref.dtype)


def _shift_flat(x, s, hw):
    """y[:, p] = x[:, p + s] if 0 <= p + s < hw else 0   (s is a static int)."""
    if s == 0:
        return x
    # TODO(synk): each flat shift could be a single pltpu.roll (XLU rotate) +
    # mask; the slice+concat form is kept for maximum lowering portability.
    zeros = jnp.zeros((x.shape[0], abs(s)), x.dtype)
    if s > 0:
        return jnp.concatenate([x[:, s:], zeros], axis=1)
    return jnp.concatenate([zeros, x[:, :hw + s]], axis=1)


def _conv3x3_taps(x, masks, W, hw):
    """im2col patches for a 3x3 / padding=1 conv on row-major flattened input.

    x:     (Cin, H*W)  spatial flattened as p = i*W + j
    masks: (9, H*W)    0/1 validity per tap (precomputed; implements padding=1)
    returns (9*Cin, H*W), tap-major (dy, dx), channel-minor.
    """
    taps = []
    for dy in range(3):
        for dx in range(3):
            t = dy * 3 + dx
            s = (dy - 1) * W + (dx - 1)
            shifted = _shift_flat(x, s, hw)
            if s == 0:
                taps.append(shifted)                # centre tap: always valid
            else:
                taps.append(shifted * masks[t:t + 1, :])
    return jnp.concatenate(taps, axis=0)


def _decoder_tail_kernel(x2_ref, up_ref, m_ref, w1_ref, s1_ref, b1_ref,
                         w2_ref, s2_ref, b2_ref, o_ref, *, W):
    """Fused concat + (conv3x3 + BN + ReLU) x2 for one batch element.

    x2_ref, up_ref : (1, C, H*W)    skip connection / upsampled features
    m_ref          : (9, H*W)       0/1 tap-validity masks (padding=1)
    w1_ref         : (Cout, 9*2C)   im2col conv1 weights, (dy,dx,cin)-minor
    w2_ref         : (Cout, 9*Cout) im2col conv2 weights
    s*_ref, b*_ref : (Cout, 1)      folded BN scale / shift
    o_ref          : (1, Cout, H*W)
    """
    hw = o_ref.shape[-1]
    masks = m_ref[...]

    # torch.cat([x2, up], dim=1) fused as a VMEM (sublane-axis) concat.
    x = jnp.concatenate([x2_ref[0], up_ref[0]], axis=0)           # (2C, H*W)

    p1 = _conv3x3_taps(x, masks, W, hw)                           # (9*2C, H*W)
    y1 = jnp.dot(w1_ref[...], p1, preferred_element_type=jnp.float32)
    y1 = jnp.maximum(y1 * s1_ref[...] + b1_ref[...], 0.0)         # (Cout, H*W)

    p2 = _conv3x3_taps(y1, masks, W, hw)                          # (9*Cout, H*W)
    y2 = jnp.dot(w2_ref[...], p2, preferred_element_type=jnp.float32)
    y2 = jnp.maximum(y2 * s2_ref[...] + b2_ref[...], 0.0)

    o_ref[0] = y2.astype(o_ref.dtype)


# ------------------------------ wrappers ----------------------------------- #

def upconv2x2_stride2(x1, w_up, b_up):
    """ConvTranspose2d(C, C, 2, stride=2) in NCHW: (N,C,h,w) -> (N,C,2h,2w)."""
    N, C, h, w = x1.shape
    x1f = x1.reshape(N, C, h * w)                        # free (row-major)
    # torch weight (Cin, Cout, kh, kw) -> rows (ki, kj, co), cols ci
    wf = jnp.transpose(w_up, (2, 3, 1, 0)).reshape(4 * C, C)
    b4 = jnp.tile(b_up, 4).reshape(4 * C, 1)
    y = pl.pallas_call(
        _upconv_kernel,
        out_shape=jax.ShapeDtypeStruct((N, 4 * C, h * w), jnp.float32),
        grid=(N,),
        in_specs=[
            pl.BlockSpec((1, C, h * w), lambda n: (n, 0, 0)),
            pl.BlockSpec((4 * C, C), lambda n: (0, 0)),
            pl.BlockSpec((4 * C, 1), lambda n: (0, 0)),
        ],
        out_specs=pl.BlockSpec((1, 4 * C, h * w), lambda n: (n, 0, 0)),
        compiler_params=pltpu.CompilerParams(
            dimension_semantics=("parallel",),
            vmem_limit_bytes=64 * 1024 * 1024),
    )(x1f, wf, b4)
    # De-interleave channel blocks (ki, kj, co) to spatial (2i+ki, 2j+kj).
    # TODO(synk): this one small XLA transpose could be folded into the next
    # kernel with strided VMEM stores; kept outside for lowering robustness.
    up = y.reshape(N, 2, 2, C, h, w).transpose(0, 3, 4, 1, 5, 2)
    return up.reshape(N, C, 2 * h, 2 * w)


def _tap_masks(H, W):
    """(9, H*W) 0/1 masks: tap (dy,dx) valid at output pixel p = i*W + j."""
    i = np.arange(H)[:, None]
    j = np.arange(W)[None, :]
    m = []
    for dy in range(3):
        for dx in range(3):
            di, dj = dy - 1, dx - 1
            valid = (i + di >= 0) & (i + di < H) & (j + dj >= 0) & (j + dj < W)
            m.append(valid.reshape(-1))
    return jnp.asarray(np.stack(m, 0), dtype=jnp.float32)


def _im2col_weight(w_oihw):
    """(Cout, Cin, 3, 3) -> (Cout, 9*Cin), columns ordered (dy, dx, cin)."""
    cout, cin = w_oihw.shape[0], w_oihw.shape[1]
    return jnp.transpose(w_oihw, (0, 2, 3, 1)).reshape(cout, 9 * cin)


def _fold_bn(conv_bias, gamma, beta, mean, var, eps=1e-5):
    scale = gamma * jax.lax.rsqrt(var + eps)
    shift = beta + (conv_bias - mean) * scale
    return scale, shift


def decoder_tail(x2f, upf, masks, w1, s1, sh1, w2, s2, sh2, H, W):
    N, C, HW = x2f.shape
    Cout = w1.shape[0]
    w1f = _im2col_weight(w1)               # (Cout, 9*2C)  lane-dense weights
    w2f = _im2col_weight(w2)               # (Cout, 9*Cout)
    kernel = functools.partial(_decoder_tail_kernel, W=W)
    # TODO(synk): at realistic UNet sizes add a row-block grid axis (1-row
    # halo) so double-buffered blocks stay a few MiB and fit v7x's 64 MiB VMEM.
    return pl.pallas_call(
        kernel,
        out_shape=jax.ShapeDtypeStruct((N, Cout, HW), jnp.float32),
        grid=(N,),
        in_specs=[
            pl.BlockSpec((1, C, HW), lambda n: (n, 0, 0)),
            pl.BlockSpec((1, C, HW), lambda n: (n, 0, 0)),
            pl.BlockSpec((9, HW), lambda n: (0, 0)),
            pl.BlockSpec((Cout, 9 * 2 * C), lambda n: (0, 0)),
            pl.BlockSpec((Cout, 1), lambda n: (0, 0)),
            pl.BlockSpec((Cout, 1), lambda n: (0, 0)),
            pl.BlockSpec((Cout, 9 * Cout), lambda n: (0, 0)),
            pl.BlockSpec((Cout, 1), lambda n: (0, 0)),
            pl.BlockSpec((Cout, 1), lambda n: (0, 0)),
        ],
        out_specs=pl.BlockSpec((1, Cout, HW), lambda n: (n, 0, 0)),
        compiler_params=pltpu.CompilerParams(
            dimension_semantics=("parallel",),
            vmem_limit_bytes=64 * 1024 * 1024),
    )(x2f, upf, masks, w1f, s1.reshape(Cout, 1), sh1.reshape(Cout, 1),
      w2f, s2.reshape(Cout, 1), sh2.reshape(Cout, 1))


def decoder_block_forward(x1_nchw, x2_nchw, params):
    """Matches DecoderBlock.forward(x1, x2); NCHW in, NCHW out."""
    N, C, h, w = x1_nchw.shape
    H, W = 2 * h, 2 * w
    Cout = params["w1"].shape[0]

    up = upconv2x2_stride2(x1_nchw, params["up_w"], params["up_b"])
    x2f = x2_nchw.reshape(N, C, H * W)     # free reshapes (row-major layout)
    upf = up.reshape(N, C, H * W)

    masks = _tap_masks(H, W)
    s1, sh1 = _fold_bn(params["b1"], params["g1"], params["be1"],
                       params["m1"], params["v1"])
    s2, sh2 = _fold_bn(params["b2"], params["g2"], params["be2"],
                       params["m2"], params["v2"])
    # TODO(synk): on v6e/v7x the matmul inputs could be cast to bf16 (with f32
    # accumulation) for ~2x DMA/MXU throughput; kept f32 for exact parity.
    out = decoder_tail(x2f, upf, masks, params["w1"], s1, sh1,
                       params["w2"], s2, sh2, H, W)
    return out.reshape(N, Cout, H, W)


# ------------------------- deterministic parameters ------------------------ #

def init_params(key, in_ch, out_ch):
    c = in_ch // 2
    ks = jax.random.split(key, 14)
    n = jax.random.normal
    return {
        # ConvTranspose2d(c, c, 2, stride=2): torch weight (Cin, Cout, 2, 2)
        "up_w": 0.2 * n(ks[0], (c, c, 2, 2), jnp.float32),
        "up_b": 0.1 * n(ks[1], (c,), jnp.float32),
        # Conv2d(in_ch, out_ch, 3, padding=1): torch weight (Cout, Cin, 3, 3)
        "w1": 0.2 * n(ks[2], (out_ch, in_ch, 3, 3), jnp.float32),
        "b1": 0.1 * n(ks[3], (out_ch,), jnp.float32),
        "g1": 1.0 + 0.1 * n(ks[4], (out_ch,), jnp.float32),
        "be1": 0.1 * n(ks[5], (out_ch,), jnp.float32),
        "m1": 0.1 * n(ks[6], (out_ch,), jnp.float32),
        "v1": jax.random.uniform(ks[7], (out_ch,), jnp.float32, 0.5, 1.5),
        # Conv2d(out_ch, out_ch, 3, padding=1)
        "w2": 0.2 * n(ks[8], (out_ch, out_ch, 3, 3), jnp.float32),
        "b2": 0.1 * n(ks[9], (out_ch,), jnp.float32),
        "g2": 1.0 + 0.1 * n(ks[10], (out_ch,), jnp.float32),
        "be2": 0.1 * n(ks[11], (out_ch,), jnp.float32),
        "m2": 0.1 * n(ks[12], (out_ch,), jnp.float32),
        "v2": jax.random.uniform(ks[13], (out_ch,), jnp.float32, 0.5, 1.5),
    }


# ------------------------------ pure-JAX reference ------------------------- #

def ref_forward(x1_nchw, x2_nchw, p):
    hp = jax.lax.Precision.HIGHEST
    x1 = jnp.transpose(x1_nchw, (0, 2, 3, 1))
    x2 = jnp.transpose(x2_nchw, (0, 2, 3, 1))
    N, h, w, c = x1.shape
    wt = jnp.transpose(p["up_w"], (2, 3, 0, 1))           # (ki, kj, ci, co)
    up = jnp.einsum("nhwc,ijcd->nhiwjd", x1, wt, precision=hp) + p["up_b"]
    up = up.reshape(N, 2 * h, 2 * w, c)
    x = jnp.concatenate([x2, up], axis=-1)

    def conv_bn_relu(xn, w_oihw, b, g, be, m, v):
        wk = jnp.transpose(w_oihw, (2, 3, 1, 0))          # HWIO
        xp = jnp.pad(xn, ((0, 0), (1, 1), (1, 1), (0, 0)))
        H, W = xn.shape[1], xn.shape[2]
        y = jnp.zeros(xn.shape[:3] + (wk.shape[-1],), jnp.float32)
        for dy in range(3):
            for dx in range(3):
                y = y + jnp.einsum("nhwc,cd->nhwd",
                                   xp[:, dy:dy + H, dx:dx + W, :], wk[dy, dx],
                                   precision=hp)
        y = y + b
        y = (y - m) / jnp.sqrt(v + 1e-5) * g + be
        return jnp.maximum(y, 0.0)

    h1 = conv_bn_relu(x, p["w1"], p["b1"], p["g1"], p["be1"], p["m1"], p["v1"])
    out = conv_bn_relu(h1, p["w2"], p["b2"], p["g2"], p["be2"], p["m2"], p["v2"])
    return jnp.transpose(out, (0, 3, 1, 2))


# ----------------------------------- main ----------------------------------- #

if __name__ == "__main__":
    in_ch, out_ch = 8, 4
    N, h, w = 2, 8, 8

    key = jax.random.PRNGKey(0)
    kp, k1, k2 = jax.random.split(key, 3)
    params = init_params(kp, in_ch, out_ch)

    # x1: low-res features (in_ch//2 channels), x2: skip connection (in_ch//2)
    x1 = jax.random.normal(k1, (N, in_ch // 2, h, w), jnp.float32)          # NCHW
    x2 = jax.random.normal(k2, (N, in_ch // 2, 2 * h, 2 * w), jnp.float32)  # NCHW

    fwd = jax.jit(functools.partial(decoder_block_forward, params=params))
    out = jax.block_until_ready(fwd(x1, x2))

    assert out.shape == (N, out_ch, 2 * h, 2 * w), out.shape
    ref = ref_forward(x1, x2, params)
    np.testing.assert_allclose(np.asarray(out), np.asarray(ref),
                               rtol=1e-4, atol=1e-4)
    print("KERNEL_OK")
</pallas_src>

<mosaic_0001>
module attributes {stable_mosaic.version = 11 : i64} {
  func.func @_upconv_kernel(%arg0: i32, %arg1: memref<1x4x64xf32, #tpu.memory_space<vmem>>, %arg2: memref<16x4xf32, #tpu.memory_space<vmem>>, %arg3: memref<16x1xf32, #tpu.memory_space<vmem>>, %arg4: memref<1x16x64xf32, #tpu.memory_space<vmem>>) attributes {dimension_semantics = [#tpu.dimension_semantics<parallel>], iteration_bounds = array<i64: 2>, scalar_prefetch = 0 : i64, scratch_operands = 0 : i64, tpu.core_type = #tpu.core_type<tc>, window_params = [{transform_indices = @transform_0, window_bounds = array<i64: 1, 4, 64>}, {pipeline_mode = #tpu.pipeline_mode<synchronous>, transform_indices = @transform_1, window_bounds = array<i64: 16, 4>}, {pipeline_mode = #tpu.pipeline_mode<synchronous>, transform_indices = @transform_2, window_bounds = array<i64: 16, 1>}, {transform_indices = @transform_3, window_bounds = array<i64: 1, 16, 64>}]} {
    %c0 = arith.constant 0 : index
    %c0_0 = arith.constant 0 : index
    %0 = vector.load %arg2[%c0, %c0_0] : memref<16x4xf32, #tpu.memory_space<vmem>>, vector<16x4xf32>
    %c0_1 = arith.constant 0 : index
    %c0_2 = arith.constant 0 : index
    %c0_3 = arith.constant 0 : index
    %1 = vector.load %arg1[%c0_1, %c0_2, %c0_3] : memref<1x4x64xf32, #tpu.memory_space<vmem>>, vector<1x4x64xf32>
    %2 = vector.shape_cast %1 : vector<1x4x64xf32> to vector<4x64xf32>
    %cst = arith.constant dense<0.000000e+00> : vector<16x64xf32>
    %3 = tpu.matmul %0, %2, %cst {dimension_numbers = #tpu.dot_dimension_numbers<[1], [0], [0], [1], [0, 0, 1, 1], [], []>} : vector<16x4xf32>, vector<4x64xf32>, vector<16x64xf32> -> vector<16x64xf32>
    %c0_4 = arith.constant 0 : index
    %c0_5 = arith.constant 0 : index
    %4 = vector.load %arg3[%c0_4, %c0_5] : memref<16x1xf32, #tpu.memory_space<vmem>>, vector<16x1xf32>
    %5 = vector.broadcast %4 : vector<16x1xf32> to vector<16x64xf32>
    %6 = arith.addf %3, %5 : vector<16x64xf32>
    %c0_6 = arith.constant 0 : index
    %c0_7 = arith.constant 0 : index
    %c0_8 = arith.constant 0 : index
    %7 = vector.load %arg4[%c0_6, %c0_7, %c0_8] : memref<1x16x64xf32, #tpu.memory_space<vmem>>, vector<1x16x64xf32>
    %8 = vector.shape_cast %7 : vector<1x16x64xf32> to vector<16x64xf32>
    %9 = vector.shape_cast %6 : vector<16x64xf32> to vector<1x16x64xf32>
    tpu.vector_store %arg4[%c0_6, %c0_7, %c0_8], %9 {strides = array<i32>} : memref<1x16x64xf32, #tpu.memory_space<vmem>>, vector<1x16x64xf32>,
    return
  }
  func.func @transform_0(%arg0: i32) -> (i32, i32, i32) {
    %c0_i32 = arith.constant 0 : i32
    %c0_i32_0 = arith.constant 0 : i32
    %c0_i32_1 = arith.constant 0 : i32
    return %arg0, %c0_i32, %c0_i32_0 : i32, i32, i32
  }
  func.func @transform_1(%arg0: i32) -> (i32, i32) {
    %c0_i32 = arith.constant 0 : i32
    %c0_i32_0 = arith.constant 0 : i32
    %c0_i32_1 = arith.constant 0 : i32
    return %c0_i32, %c0_i32_0 : i32, i32
  }
  func.func @transform_2(%arg0: i32) -> (i32, i32) {
    %c0_i32 = arith.constant 0 : i32
    %c0_i32_0 = arith.constant 0 : i32
    %c0_i32_1 = arith.constant 0 : i32
    return %c0_i32, %c0_i32_0 : i32, i32
  }
  func.func @transform_3(%arg0: i32) -> (i32, i32, i32) {
    %c0_i32 = arith.constant 0 : i32
    %c0_i32_0 = arith.constant 0 : i32
    %c0_i32_1 = arith.constant 0 : i32
    return %arg0, %c0_i32, %c0_i32_0 : i32, i32, i32
  }
}

module attributes {stable_mosaic.version = 11 : i64} {
  func.func @_decoder_tail_kernel(%arg0: i32, %arg1: memref<1x4x256xf32, #tpu.memory_space<vmem>>, %arg2: memref<1x4x256xf32, #tpu.memory_space<vmem>>, %arg3: memref<9x256xf32, #tpu.memory_space<vmem>>, %arg4: memref<4x72xf32, #tpu.memory_space<vmem>>, %arg5: memref<4x1xf32, #tpu.memory_space<vmem>>, %arg6: memref<4x1xf32, #tpu.memory_space<vmem>>, %arg7: memref<4x36xf32, #tpu.memory_space<vmem>>, %arg8: memref<4x1xf32, #tpu.memory_space<vmem>>, %arg9: memref<4x1xf32, #tpu.memory_space<vmem>>, %arg10: memref<1x4x256xf32, #tpu.memory_space<vmem>>) attributes {dimension_semantics = [#tpu.dimension_semantics<parallel>], iteration_bounds = array<i64: 2>, scalar_prefetch = 0 : i64, scratch_operands = 0 : i64, tpu.core_type = #tpu.core_type<tc>, window_params = [{transform_indices = @transform_0, window_bounds = array<i64: 1, 4, 256>}, {transform_indices = @transform_1, window_bounds = array<i64: 1, 4, 256>}, {pipeline_mode = #tpu.pipeline_mode<synchronous>, transform_indices = @transform_2, window_bounds = array<i64: 9, 256>}, {pipeline_mode = #tpu.pipeline_mode<synchronous>, transform_indices = @transform_3, window_bounds = array<i64: 4, 72>}, {pipeline_mode = #tpu.pipeline_mode<synchronous>, transform_indices = @transform_4, window_bounds = array<i64: 4, 1>}, {pipeline_mode = #tpu.pipeline_mode<synchronous>, transform_indices = @transform_5, window_bounds = array<i64: 4, 1>}, {pipeline_mode = #tpu.pipeline_mode<synchronous>, transform_indices = @transform_6, window_bounds = array<i64: 4, 36>}, {pipeline_mode = #tpu.pipeline_mode<synchronous>, transform_indices = @transform_7, window_bounds = array<i64: 4, 1>}, {pipeline_mode = #tpu.pipeline_mode<synchronous>, transform_indices = @transform_8, window_bounds = array<i64: 4, 1>}, {transform_indices = @transform_9, window_bounds = array<i64: 1, 4, 256>}]} {
    %c0 = arith.constant 0 : index
    %c0_0 = arith.constant 0 : index
    %0 = vector.load %arg3[%c0, %c0_0] : memref<9x256xf32, #tpu.memory_space<vmem>>, vector<9x256xf32>
    %c0_1 = arith.constant 0 : index
    %c0_2 = arith.constant 0 : index
    %c0_3 = arith.constant 0 : index
    %1 = vector.load %arg1[%c0_1, %c0_2, %c0_3] : memref<1x4x256xf32, #tpu.memory_space<vmem>>, vector<1x4x256xf32>
    %2 = vector.shape_cast %1 : vector<1x4x256xf32> to vector<4x256xf32>
    %c0_4 = arith.constant 0 : index
    %c0_5 = arith.constant 0 : index
    %c0_6 = arith.constant 0 : index
    %3 = vector.load %arg2[%c0_4, %c0_5, %c0_6] : memref<1x4x256xf32, #tpu.memory_space<vmem>>, vector<1x4x256xf32>
    %4 = vector.shape_cast %3 : vector<1x4x256xf32> to vector<4x256xf32>
    %5 = tpu.concatenate %2, %4 in 0 : vector<4x256xf32>, vector<4x256xf32> -> vector<8x256xf32>
    %cst = arith.constant 0.000000e+00 : f32
    %6 = vector.broadcast %cst : f32 to vector<8x17xf32>
    %7 = vector.extract_strided_slice %5 {offsets = [0, 0], sizes = [8, 239], strides = [1, 1]} : vector<8x256xf32> to vector<8x239xf32>
    %8 = tpu.concatenate %6, %7 in 1 : vector<8x17xf32>, vector<8x239xf32> -> vector<8x256xf32>
    %9 = vector.extract_strided_slice %0 {offsets = [0, 0], sizes = [1, 256], strides = [1, 1]} : vector<9x256xf32> to vector<1x256xf32>
    %10 = vector.broadcast %9 : vector<1x256xf32> to vector<8x256xf32>
    %11 = arith.mulf %8, %10 : vector<8x256xf32>
    %cst_7 = arith.constant 0.000000e+00 : f32
    %12 = vector.broadcast %cst_7 : f32 to vector<8x16xf32>
    %13 = vector.extract_strided_slice %5 {offsets = [0, 0], sizes = [8, 240], strides = [1, 1]} : vector<8x256xf32> to vector<8x240xf32>
    %14 = tpu.concatenate %12, %13 in 1 : vector<8x16xf32>, vector<8x240xf32> -> vector<8x256xf32>
    %15 = vector.extract_strided_slice %0 {offsets = [1, 0], sizes = [1, 256], strides = [1, 1]} : vector<9x256xf32> to vector<1x256xf32>
    %16 = vector.broadcast %15 : vector<1x256xf32> to vector<8x256xf32>
    %17 = arith.mulf %14, %16 : vector<8x256xf32>
    %cst_8 = arith.constant 0.000000e+00 : f32
    %18 = vector.broadcast %cst_8 : f32 to vector<8x15xf32>
    %19 = vector.extract_strided_slice %5 {offsets = [0, 0], sizes = [8, 241], strides = [1, 1]} : vector<8x256xf32> to vector<8x241xf32>
    %20 = tpu.concatenate %18, %19 in 1 : vector<8x15xf32>, vector<8x241xf32> -> vector<8x256xf32>
    %21 = vector.extract_strided_slice %0 {offsets = [2, 0], sizes = [1, 256], strides = [1, 1]} : vector<9x256xf32> to vector<1x256xf32>
    %22 = vector.broadcast %21 : vector<1x256xf32> to vector<8x256xf32>
    %23 = arith.mulf %20, %22 : vector<8x256xf32>
    %cst_9 = arith.constant 0.000000e+00 : f32
    %24 = vector.broadcast %cst_9 : f32 to vector<8x1xf32>
    %25 = vector.extract_strided_slice %5 {offsets = [0, 0], sizes = [8, 255], strides = [1, 1]} : vector<8x256xf32> to vector<8x255xf32>
    %26 = tpu.concatenate %24, %25 in 1 : vector<8x1xf32>, vector<8x255xf32> -> vector<8x256xf32>
    %27 = vector.extract_strided_slice %0 {offsets = [3, 0], sizes = [1, 256], strides = [1, 1]} : vector<9x256xf32> to vector<1x256xf32>
    %28 = vector.broadcast %27 : vector<1x256xf32> to vector<8x256xf32>
    %29 = arith.mulf %26, %28 : vector<8x256xf32>
    %cst_10 = arith.constant 0.000000e+00 : f32
    %30 = vector.broadcast %cst_10 : f32 to vector<8x1xf32>
    %31 = vector.extract_strided_slice %5 {offsets = [0, 1], sizes = [8, 255], strides = [1, 1]} : vector<8x256xf32> to vector<8x255xf32>
    %32 = tpu.concatenate %31, %30 in 1 : vector<8x255xf32>, vector<8x1xf32> -> vector<8x256xf32>
    %33 = vector.extract_strided_slice %0 {offsets = [5, 0], sizes = [1, 256], strides = [1, 1]} : vector<9x256xf32> to vector<1x256xf32>
    %34 = vector.broadcast %33 : vector<1x256xf32> to vector<8x256xf32>
    %35 = arith.mulf %32, %34 : vector<8x256xf32>
    %cst_11 = arith.constant 0.000000e+00 : f32
    %36 = vector.broadcast %cst_11 : f32 to vector<8x15xf32>
    %37 = vector.extract_strided_slice %5 {offsets = [0, 15], sizes = [8, 241], strides = [1, 1]} : vector<8x256xf32> to vector<8x241xf32>
    %38 = tpu.concatenate %37, %36 in 1 : vector<8x241xf32>, vector<8x15xf32> -> vector<8x256xf32>
    %39 = vector.extract_strided_slice %0 {offsets = [6, 0], sizes = [1, 256], strides = [1, 1]} : vector<9x256xf32> to vector<1x256xf32>
    %40 = vector.broadcast %39 : vector<1x256xf32> to vector<8x256xf32>
    %41 = arith.mulf %38, %40 : vector<8x256xf32>
    %cst_12 = arith.constant 0.000000e+00 : f32
    %42 = vector.broadcast %cst_12 : f32 to vector<8x16xf32>
    %43 = vector.extract_strided_slice %5 {offsets = [0, 16], sizes = [8, 240], strides = [1, 1]} : vector<8x256xf32> to vector<8x240xf32>
    %44 = tpu.concatenate %43, %42 in 1 : vector<8x240xf32>, vector<8x16xf32> -> vector<8x256xf32>
    %45 = vector.extract_strided_slice %0 {offsets = [7, 0], sizes = [1, 256], strides = [1, 1]} : vector<9x256xf32> to vector<1x256xf32>
    %46 = vector.broadcast %45 : vector<1x256xf32> to vector<8x256xf32>
    %47 = arith.mulf %44, %46 : vector<8x256xf32>
    %cst_13 = arith.constant 0.000000e+00 : f32
    %48 = vector.broadcast %cst_13 : f32 to vector<8x17xf32>
    %49 = vector.extract_strided_slice %5 {offsets = [0, 17], sizes = [8, 239], strides = [1, 1]} : vector<8x256xf32> to vector<8x239xf32>
    %50 = tpu.concatenate %49, %48 in 1 : vector<8x239xf32>, vector<8x17xf32> -> vector<8x256xf32>
    %51 = vector.extract_strided_slice %0 {offsets = [8, 0], sizes = [1, 256], strides = [1, 1]} : vector<9x256xf32> to vector<1x256xf32>
    %52 = vector.broadcast %51 : vector<1x256xf32> to vector<8x256xf32>
    %53 = arith.mulf %50, %52 : vector<8x256xf32>
    %54 = tpu.concatenate %11, %17, %23, %29, %5, %35, %41, %47, %53 in 0 : vector<8x256xf32>, vector<8x256xf32>, vector<8x256xf32>, vector<8x256xf32>, vector<8x256xf32>, vector<8x256xf32>, vector<8x256xf32>, vector<8x256xf32>, vector<8x256xf32> -> vector<72x256xf32>
    %c0_14 = arith.constant 0 : index
    %c0_15 = arith.constant 0 : index
    %55 = vector.load %arg4[%c0_14, %c0_15] : memref<4x72xf32, #tpu.memory_space<vmem>>, vector<4x72xf32>
    %cst_16 = arith.constant dense<0.000000e+00> : vector<4x256xf32>
    %56 = tpu.matmul %55, %54, %cst_16 {dimension_numbers = #tpu.dot_dimension_numbers<[1], [0], [0], [1], [0, 0, 1, 1], [], []>} : vector<4x72xf32>, vector<72x256xf32>, vector<4x256xf32> -> vector<4x256xf32>
    %c0_17 = arith.constant 0 : index
    %c0_18 = arith.constant 0 : index
    %57 = vector.load %arg5[%c0_17, %c0_18] : memref<4x1xf32, #tpu.memory_space<vmem>>, vector<4x1xf32>
    %58 = vector.broadcast %57 : vector<4x1xf32> to vector<4x256xf32>
    %59 = arith.mulf %56, %58 : vector<4x256xf32>
    %c0_19 = arith.constant 0 : index
    %c0_20 = arith.constant 0 : index
    %60 = vector.load %arg6[%c0_19, %c0_20] : memref<4x1xf32, #tpu.memory_space<vmem>>, vector<4x1xf32>
    %61 = vector.broadcast %60 : vector<4x1xf32> to vector<4x256xf32>
    %62 = arith.addf %59, %61 : vector<4x256xf32>
    %cst_21 = arith.constant 0.000000e+00 : f32
    %63 = vector.broadcast %cst_21 : f32 to vector<4x256xf32>
    %64 = arith.maximumf %62, %63 : vector<4x256xf32>
    %cst_22 = arith.constant 0.000000e+00 : f32
    %65 = vector.broadcast %cst_22 : f32 to vector<4x17xf32>
    %66 = vector.extract_strided_slice %64 {offsets = [0, 0], sizes = [4, 239], strides = [1, 1]} : vector<4x256xf32> to vector<4x239xf32>
    %67 = tpu.concatenate %65, %66 in 1 : vector<4x17xf32>, vector<4x239xf32> -> vector<4x256xf32>
    %68 = vector.extract_strided_slice %0 {offsets = [0, 0], sizes = [1, 256], strides = [1, 1]} : vector<9x256xf32> to vector<1x256xf32>
    %69 = vector.broadcast %68 : vector<1x256xf32> to vector<4x256xf32>
    %70 = arith.mulf %67, %69 : vector<4x256xf32>
    %cst_23 = arith.constant 0.000000e+00 : f32
    %71 = vector.broadcast %cst_23 : f32 to vector<4x16xf32>
    %72 = vector.extract_strided_slice %64 {offsets = [0, 0], sizes = [4, 240], strides = [1, 1]} : vector<4x256xf32> to vector<4x240xf32>
    %73 = tpu.concatenate %71, %72 in 1 : vector<4x16xf32>, vector<4x240xf32> -> vector<4x256xf32>
    %74 = vector.extract_strided_slice %0 {offsets = [1, 0], sizes = [1, 256], strides = [1, 1]} : vector<9x256xf32> to vector<1x256xf32>
    %75 = vector.broadcast %74 : vector<1x256xf32> to vector<4x256xf32>
    %76 = arith.mulf %73, %75 : vector<4x256xf32>
    %cst_24 = arith.constant 0.000000e+00 : f32
    %77 = vector.broadcast %cst_24 : f32 to vector<4x15xf32>
    %78 = vector.extract_strided_slice %64 {offsets = [0, 0], sizes = [4, 241], strides = [1, 1]} : vector<4x256xf32> to vector<4x241xf32>
    %79 = tpu.concatenate %77, %78 in 1 : vector<4x15xf32>, vector<4x241xf32> -> vector<4x256xf32>
    %80 = vector.extract_strided_slice %0 {offsets = [2, 0], sizes = [1, 256], strides = [1, 1]} : vector<9x256xf32> to vector<1x256xf32>
    %81 = vector.broadcast %80 : vector<1x256xf32> to vector<4x256xf32>
    %82 = arith.mulf %79, %81 : vector<4x256xf32>
    %cst_25 = arith.constant 0.000000e+00 : f32
    %83 = vector.broadcast %cst_25 : f32 to vector<4x1xf32>
    %84 = vector.extract_strided_slice %64 {offsets = [0, 0], sizes = [4, 255], strides = [1, 1]} : vector<4x256xf32> to vector<4x255xf32>
    %85 = tpu.concatenate %83, %84 in 1 : vector<4x1xf32>, vector<4x255xf32> -> vector<4x256xf32>
    %86 = vector.extract_strided_slice %0 {offsets = [3, 0], sizes = [1, 256], strides = [1, 1]} : vector<9x256xf32> to vector<1x256xf32>
    %87 = vector.broadcast %86 : vector<1x256xf32> to vector<4x256xf32>
    %88 = arith.mulf %85, %87 : vector<4x256xf32>
    %cst_26 = arith.constant 0.000000e+00 : f32
    %89 = vector.broadcast %cst_26 : f32 to vector<4x1xf32>
    %90 = vector.extract_strided_slice %64 {offsets = [0, 1], sizes = [4, 255], strides = [1, 1]} : vector<4x256xf32> to vector<4x255xf32>
    %91 = tpu.concatenate %90, %89 in 1 : vector<4x255xf32>, vector<4x1xf32> -> vector<4x256xf32>
    %92 = vector.extract_strided_slice %0 {offsets = [5, 0], sizes = [1, 256], strides = [1, 1]} : vector<9x256xf32> to vector<1x256xf32>
    %93 = vector.broadcast %92 : vector<1x256xf32> to vector<4x256xf32>
    %94 = arith.mulf %91, %93 : vector<4x256xf32>
    %cst_27 = arith.constant 0.000000e+00 : f32
    %95 = vector.broadcast %cst_27 : f32 to vector<4x15xf32>
    %96 = vector.extract_strided_slice %64 {offsets = [0, 15], sizes = [4, 241], strides = [1, 1]} : vector<4x256xf32> to vector<4x241xf32>
    %97 = tpu.concatenate %96, %95 in 1 : vector<4x241xf32>, vector<4x15xf32> -> vector<4x256xf32>
    %98 = vector.extract_strided_slice %0 {offsets = [6, 0], sizes = [1, 256], strides = [1, 1]} : vector<9x256xf32> to vector<1x256xf32>
    %99 = vector.broadcast %98 : vector<1x256xf32> to vector<4x256xf32>
    %100 = arith.mulf %97, %99 : vector<4x256xf32>
    %cst_28 = arith.constant 0.000000e+00 : f32
    %101 = vector.broadcast %cst_28 : f32 to vector<4x16xf32>
    %102 = vector.extract_strided_slice %64 {offsets = [0, 16], sizes = [4, 240], strides = [1, 1]} : vector<4x256xf32> to vector<4x240xf32>
    %103 = tpu.concatenate %102, %101 in 1 : vector<4x240xf32>, vector<4x16xf32> -> vector<4x256xf32>
    %104 = vector.extract_strided_slice %0 {offsets = [7, 0], sizes = [1, 256], strides = [1, 1]} : vector<9x256xf32> to vector<1x256xf32>
    %105 = vector.broadcast %104 : vector<1x256xf32> to vector<4x256xf32>
    %106 = arith.mulf %103, %105 : vector<4x256xf32>
    %cst_29 = arith.constant 0.000000e+00 : f32
    %107 = vector.broadcast %cst_29 : f32 to vector<4x17xf32>
    %108 = vector.extract_strided_slice %64 {offsets = [0, 17], sizes = [4, 239], strides = [1, 1]} : vector<4x256xf32> to vector<4x239xf32>
    %109 = tpu.concatenate %108, %107 in 1 : vector<4x239xf32>, vector<4x17xf32> -> vector<4x256xf32>
    %110 = vector.extract_strided_slice %0 {offsets = [8, 0], sizes = [1, 256], strides = [1, 1]} : vector<9x256xf32> to vector<1x256xf32>
    %111 = vector.broadcast %110 : vector<1x256xf32> to vector<4x256xf32>
    %112 = arith.mulf %109, %111 : vector<4x256xf32>
    %113 = tpu.concatenate %70, %76, %82, %88, %64, %94, %100, %106, %112 in 0 : vector<4x256xf32>, vector<4x256xf32>, vector<4x256xf32>, vector<4x256xf32>, vector<4x256xf32>, vector<4x256xf32>, vector<4x256xf32>, vector<4x256xf32>, vector<4x256xf32> -> vector<36x256xf32>
    %c0_30 = arith.constant 0 : index
    %c0_31 = arith.constant 0 : index
    %114 = vector.load %arg7[%c0_30, %c0_31] : memref<4x36xf32, #tpu.memory_space<vmem>>, vector<4x36xf32>
    %cst_32 = arith.constant dense<0.000000e+00> : vector<4x256xf32>
    %115 = tpu.matmul %114, %113, %cst_32 {dimension_numbers = #tpu.dot_dimension_numbers<[1], [0], [0], [1], [0, 0, 1, 1], [], []>} : vector<4x36xf32>, vector<36x256xf32>, vector<4x256xf32> -> vector<4x256xf32>
    %c0_33 = arith.constant 0 : index
    %c0_34 = arith.constant 0 : index
    %116 = vector.load %arg8[%c0_33, %c0_34] : memref<4x1xf32, #tpu.memory_space<vmem>>, vector<4x1xf32>
    %117 = vector.broadcast %116 : vector<4x1xf32> to vector<4x256xf32>
    %118 = arith.mulf %115, %117 : vector<4x256xf32>
    %c0_35 = arith.constant 0 : index
    %c0_36 = arith.constant 0 : index
    %119 = vector.load %arg9[%c0_35, %c0_36] : memref<4x1xf32, #tpu.memory_space<vmem>>, vector<4x1xf32>
    %120 = vector.broadcast %119 : vector<4x1xf32> to vector<4x256xf32>
    %121 = arith.addf %118, %120 : vector<4x256xf32>
    %cst_37 = arith.constant 0.000000e+00 : f32
    %122 = vector.broadcast %cst_37 : f32 to vector<4x256xf32>
    %123 = arith.maximumf %121, %122 : vector<4x256xf32>
    %c0_38 = arith.constant 0 : index
    %c0_39 = arith.constant 0 : index
    %c0_40 = arith.constant 0 : index
    %124 = vector.load %arg10[%c0_38, %c0_39, %c0_40] : memref<1x4x256xf32, #tpu.memory_space<vmem>>, vector<1x4x256xf32>
    %125 = vector.shape_cast %124 : vector<1x4x256xf32> to vector<4x256xf32>
    %126 = vector.shape_cast %123 : vector<4x256xf32> to vector<1x4x256xf32>
    tpu.vector_store %arg10[%c0_38, %c0_39, %c0_40], %126 {strides = array<i32>} : memref<1x4x256xf32, #tpu.memory_space<vmem>>, vector<1x4x256xf32>,
    return
  }
  func.func @transform_0(%arg0: i32) -> (i32, i32, i32) {
    %c0_i32 = arith.constant 0 : i32
    %c0_i32_0 = arith.constant 0 : i32
    %c0_i32_1 = arith.constant 0 : i32
    return %arg0, %c0_i32, %c0_i32_0 : i32, i32, i32
  }
  func.func @transform_1(%arg0: i32) -> (i32, i32, i32) {
    %c0_i32 = arith.constant 0 : i32
    %c0_i32_0 = arith.constant 0 : i32
    %c0_i32_1 = arith.constant 0 : i32
    return %arg0, %c0_i32, %c0_i32_0 : i32, i32, i32
  }
  func.func @transform_2(%arg0: i32) -> (i32, i32) {
    %c0_i32 = arith.constant 0 : i32
    %c0_i32_0 = arith.constant 0 : i32
    %c0_i32_1 = arith.constant 0 : i32
    return %c0_i32, %c0_i32_0 : i32, i32
  }
  func.func @transform_3(%arg0: i32) -> (i32, i32) {
    %c0_i32 = arith.constant 0 : i32
    %c0_i32_0 = arith.constant 0 : i32
    %c0_i32_1 = arith.constant 0 : i32
    return %c0_i32, %c0_i32_0 : i32, i32
  }
  func.func @transform_4(%arg0: i32) -> (i32, i32) {
    %c0_i32 = arith.constant 0 : i32
    %c0_i32_0 = arith.constant 0 : i32
    %c0_i32_1 = arith.constant 0 : i32
    return %c0_i32, %c0_i32_0 : i32, i32
  }
  func.func @transform_5(%arg0: i32) -> (i32, i32) {
    %c0_i32 = arith.constant 0 : i32
    %c0_i32_0 = arith.constant 0 : i32
    %c0_i32_1 = arith.constant 0 : i32
    return %c0_i32, %c0_i32_0 : i32, i32
  }
  func.func @transform_6(%arg0: i32) -> (i32, i32) {
    %c0_i32 = arith.constant 0 : i32
    %c0_i32_0 = arith.constant 0 : i32
    %c0_i32_1 = arith.constant 0 : i32
    return %c0_i32, %c0_i32_0 : i32, i32
  }
  func.func @transform_7(%arg0: i32) -> (i32, i32) {
    %c0_i32 = arith.constant 0 : i32
    %c0_i32_0 = arith.constant 0 : i32
    %c0_i32_1 = arith.constant 0 : i32
    return %c0_i32, %c0_i32_0 : i32, i32
  }
  func.func @transform_8(%arg0: i32) -> (i32, i32) {
    %c0_i32 = arith.constant 0 : i32
    %c0_i32_0 = arith.constant 0 : i32
    %c0_i32_1 = arith.constant 0 : i32
    return %c0_i32, %c0_i32_0 : i32, i32
  }
  func.func @transform_9(%arg0: i32) -> (i32, i32, i32) {
    %c0_i32 = arith.constant 0 : i32
    %c0_i32_0 = arith.constant 0 : i32
    %c0_i32_1 = arith.constant 0 : i32
    return %arg0, %c0_i32, %c0_i32_0 : i32, i32, i32
  }
}

</mosaic_0001>

<bundles_post_ra>
// kernel: tile.6
= control target key start
LH: loop header
LB: loop body
LE: loop exit
PB: predicated region body
PF: predicated region fallthrough
CT: control target
= control target key end

     0   :  { %s22_s0 = inlined_call_operand.vmem [shape: f32[4], index: 0, kind: input, shape index: {}]   ;;  %s23_s1 = inlined_call_operand.vmem [shape: f32[4,4], index: 1, kind: output, shape index: {}]  }
   0x1   :  { %v4_v0 = vld [vmem:[%s22_s0] ss:$0 sm:$0xff] }
   0x2   :  { %5 = vst [vmem:[%s23_s1] sm:$0xf] %v4_v0 }

// kernel: tile.0
= control target key start
LH: loop header
LB: loop body
LE: loop exit
PB: predicated region body
PF: predicated region fallthrough
CT: control target
= control target key end

     0   :  { %s95_s0 = inlined_call_operand.vmem [shape: f32[4,4], index: 0, kind: input, shape index: {}]   ;;  %s96_s1 = inlined_call_operand.hbm [shape: f32[16,1], index: 1, kind: output, shape index: {}]  }
   0x1   :  { %v5_v0 = vld [vmem:[%s95_s0] sm:$0xf] }
   0x2   :  { %6 = vst [vmem:[#allocation2] sm:$0xf] %v5_v0 }
   0x3   :  { %2 = vsyncpa [#allocation1], 0  ;;  %s66_s0 = smov 127   ;;  %s67_s8 = smov 125   ;;  %vm8_vm0 = vcmask 7168  }
   0x4   :  { %s68_s9 = smov 126   ;;  %s69_s10 = smov [#allocation0]  }
   0x5   :  { %s32_s11 = sshll.u32 %s69_s10, 4  ;;  %s33_s11 = int_to_ptr.vmem [resolvable:$true] %s32_s11 }
   0x6   :  { %s42_s12 = scalar_lea.vmem %s33_s11, 256  ;;  %p47_p1 = scmp.lt.s32.totalorder %s33_s11, %s33_s11 }
   0x7   :  { %p43_p0 = scmp.ne.s32.totalorder %s33_s11, %s42_s12  ;;  %p48_p2 = scmp.lt.s32.totalorder %s42_s12, %s42_s12 }
   0x9   :  { %v10_v1 = vld [vmem:[#allocation2] sm:$0xf]   ;;  %p49_p3 = por %p48_p2, %p47_p1 }
   0xa   :  { %v22_v2 = vld [vmem:[#allocation2] sm:$0xf]   ;;  %11 = vrot.lane.b32.xlu0 %v10_v1, %s66_s0 }
   0xb   :  { %23 = vrot.lane.b32.xlu1 %v22_v2, %s67_s8  ;;  %v7_v3 = vld [vmem:[#allocation2] sm:$0xf]   ;;  %p50_p4 = pnand %p49_p3, %p43_p0 }
   0xc   :  { %v16_v4 = vld [vmem:[#allocation2] sm:$0xf]   ;;  %9 = vst.msk [vmem:[#allocation0] ss:$4 sm:$0xf] %vm8_vm0, %v7_v3  }
   0xe   :  { %17 = vrot.lane.b32.xlu0 %v16_v4, %s68_s9 }
  0x7c   :  { %v12_v5 = vpop.permute.xlu0 %11  }
  0x7d   :  { %v24_v6 = vpop.permute.xlu1 %23   ;;  %15 = vst.msk [vmem:[#allocation0 + $0x1] ss:$4 sm:$0xf] %vm8_vm0, %v12_v5  }
  0x7e   :  { %27 = vst.msk [vmem:[#allocation0 + $0x3] ss:$4 sm:$0xf] %vm8_vm0, %v24_v6  }
  0x80   :  { %v18_v7 = vpop.permute.xlu0 %17  }
  0x81   :  { %21 = vst.msk [vmem:[#allocation0 + $0x2] ss:$4 sm:$0xf] %vm8_vm0, %v18_v7  }
  0x82   :  { %53 = shalt.err (!%p50_p4)
}
  0x83   :  { %s54_s15 = scalar_lea.hbm %s96_s1, 256 }
  0x84   :  { %p55_p5 = scmp.ne.s32.totalorder %s96_s1, %s54_s15  ;;  %p58_p6 = scmp.lt.u32.totalorder %s54_s15, %s96_s1 }
  0x86   :  { %p60_p7 = pnand %p58_p6, %p55_p5 }
  0x88   :  { %63 = shalt.err (!%p60_p7)
}
  0x89   :  { %35 = dma.vmem_to_hbm [thread:$0]  %s33_s11, 256, %s96_s1, [#allocation1]  }
  0x8a   :  { %64 = dma.done.wait [#allocation1], 256  }
  0x8b   :  { %65 = vsyncadd [#allocation1], 4294967040 }
  0x8c   :  { %37 = vsyncpa [#allocation1], 1 }

// kernel: decoder_block_forward.2
= control target key start
LH: loop header
LB: loop body
LE: loop exit
PB: predicated region body
PF: predicated region fallthrough
CT: control target
= control target key end

     0   :  { %8 = vsyncpa [#allocation3], 0  ;;  %s946_s0 = inlined_call_operand.hbm [shape: f32[2,4,64], index: 0, kind: input, shape index: {}]   ;;  %s947_s1 = inlined_call_operand.hbm [shape: f32[16,4], index: 1, kind: input, shape index: {}]   ;;  %s948_s2 = inlined_call_operand.hbm [shape: f32[16,1], index: 2, kind: input, shape index: {}]   ;;  %s949_s3 = inlined_call_operand.hbm [shape: f32[2,16,64], index: 3, kind: output, shape index: {}]  }
   0x1   :  { %10 = vsyncpa [#allocation3 + $0x1], 0 }
   0x2   :  { %11 = vsyncpa [#allocation6], 0 }
   0x3   :  { %12 = vsyncpa [#allocation4], 0 }
   0x4   :  { %14 = vsyncpa [#allocation4 + $0x1], 0  ;;  %s714_s12 = smov 0   ;;  %s716_s13 = smov 0  }
   0x5   :  { %s718_s14 = smov 0   ;;  %s720_s15 = smov 0  }
   0x6 LB: > { %s735_s16 = sadd.s32 4294967295, %s683_s15   ;;  %s425_s17 = sadd.s32 4294967294, %s683_s15   ;;  %s683_s15 = sphi %s720_s15, %s969_s15   ;;  %s679_s14 = sphi %s718_s14, %s968_s14   ;;  %s675_s13 = sphi %s716_s13, %s967_s13   ;;  %s671_s12 = sphi %s714_s12, %s966_s12  }
   0x7   : > { %p40_p0 = scmp.ne.s32.totalorder %s675_s13, %s671_s12  ;;  %p950_p1 = scmp.eq.s32.totalorder %s735_s16, 0 }
   0x8   : > { %p112_p3 = scmp.eq.s32.totalorder %s425_s17, 1  ;;  %p426_p5 = scmp.ge.s32.totalorder %s683_s15, 1 }
   0x9   : > { %p744_p4 = por %p950_p1, %p40_p0  ;;  %p119_p7 = scmp.lt.s32.totalorder %s683_s15, 3 }
   0xa   : > { %p749_p6 = por %p112_p3, %p40_p0  ;;  %s685_s21 = smov [#allocation5]  }
   0xb   : > { %s953_s18 = scalar_select %p744_p4, 1, 0 }
   0xc   : > { %s954_s19 = scalar_select %p749_p6, 1, 0 }
   0xd   : > { %p754_p8 = pnand %p426_p5, %p119_p7  ;;  %s131_s22 = sshll.u32 %s685_s21, 4  ;;  %s758_s22 = int_to_ptr.vmem [resolvable:$true] %s131_s22 }
   0xe   : > { %s686_s24 = smov [#allocation7]   ;;  %s527_s28 = scalar_lea.hbm %s947_s1, 256 }
   0xf   : > { %p466_p9 = pneg %p754_p8  ;;  %s144_s25 = sshll.u32 %s686_s24, 4  ;;  %s769_s25 = int_to_ptr.vmem [resolvable:$true] %s144_s25 }
  0x10   : > { %p528_p12 = scmp.ne.s32.totalorder %s947_s1, %s527_s28  ;;  %p534_p5 = scmp.lt.u32.totalorder %s527_s28, %s947_s1 }
  0x11   : > { %p765_p11 = pnand %p466_p9, %p950_p1 }
  0x13   : > { %p529_p13 = pneg %p765_p11 }
  0x15   : > { %p530_p0 = pnand %p529_p13, %p528_p12 }
  0x17   : > { %p531_p3 = pneg %p530_p0 }
  0x19   : > { %p536_p7 = pnand %p534_p5, %p531_p3 }
  0x1b   : > { %539 = shalt.err (!%p536_p7)
}
  0x1c   : > { %s540_s6 = scalar_lea.vmem %s758_s22, 256  ;;  %p548_p2 = scmp.lt.s32.totalorder %s758_s22, %s758_s22 }
  0x1d   : > { %p541_p9 = scmp.ne.s32.totalorder %s758_s22, %s540_s6  ;;  %p549_p12 = scmp.lt.s32.totalorder %s540_s6, %s540_s6 }
  0x1f   : > { %p543_p10 = pnand %p541_p9, %p529_p13  ;;  %p550_p0 = por %p549_p12, %p548_p2 }
  0x21   : > { %p544_p1 = pneg %p543_p10 }
  0x23   : > { %p551_p6 = pnand %p550_p0, %p544_p1 }
  0x25   : > { %554 = shalt.err (!%p551_p6)
}
  0x26   : > { %s687_s7 = smov 128   ;;  %s688_s8 = smov 8  }
  0x27   : > { %469 = dma.hbm_to_vmem [thread:$0]  (!%p765_p11), %s947_s1, 256, %s758_s22, [#allocation6], %s687_s7, %s687_s7, %s688_s8  }
  0x28   : > { %s555_s21 = scalar_lea.hbm %s948_s2, 256 }
  0x29   : > { %p556_p2 = scmp.ne.s32.totalorder %s948_s2, %s555_s21  ;;  %p562_p10 = scmp.lt.u32.totalorder %s555_s21, %s948_s2 }
  0x2b   : > { %p558_p1 = pnand %p556_p2, %p529_p13 }
  0x2d   : > { %p559_p6 = pneg %p558_p1 }
  0x2f   : > { %p564_p3 = pnand %p562_p10, %p559_p6 }
  0x31   : > { %567 = shalt.err (!%p564_p3)
}
  0x32   : > { %s568_s22 = scalar_lea.vmem %s769_s25, 256  ;;  %p576_p12 = scmp.lt.s32.totalorder %s769_s25, %s769_s25 }
  0x33   : > { %p569_p5 = scmp.ne.s32.totalorder %s769_s25, %s568_s22  ;;  %p577_p0 = scmp.lt.s32.totalorder %s568_s22, %s568_s22 }
  0x35   : > { %p571_p7 = pnand %p569_p5, %p529_p13  ;;  %p578_p2 = por %p577_p0, %p576_p12 }
  0x37   : > { %p572_p9 = pneg %p571_p7 }
  0x39   : > { %p579_p1 = pnand %p578_p2, %p572_p9 }
  0x3b   : > { %582 = shalt.err (!%p579_p1)
}
  0x3c   : > { %472 = dma.hbm_to_vmem [thread:$0]  (!%p765_p11), %s948_s2, 256, %s769_s25, [#allocation6], %s687_s7, %s687_s7, %s688_s8  }
  0x3d   : > { %s824_s4 = sadd.s32 1, %s683_s15   ;;  %s27_s23 = sadd.s32 1, %s679_s14 }
  0x3e   : > { %s24_s5 = ssub.s32 %s683_s15, %s824_s4  ;;  %p34_p13 = scmp.ne.s32.totalorder %s679_s14, %s675_s13 }
  0x3f   : > { %p25_p6 = scmp.eq.s32.totalorder %s24_s5, 0  ;;  %p35_p10 = scmp.eq.s32.totalorder %s683_s15, 0 }
  0x40   : > { %p957_p3 = scmp.eq.s32.totalorder %s735_s16, 1  ;;  %p483_p7 = scmp.lt.s32.totalorder %s683_s15, 2 }
  0x41   : > { %s840_s9 = scalar_select %p25_p6, %s679_s14, %s27_s23  }
  0x42   : > { %p834_p5 = por %p957_p3, %p34_p13  ;;  %p36_p9 = por %p35_p10, %p34_p13 }
  0x43   : > { %s158_s10 = sand.u32 1, %s679_s14   ;;  %s431_s25 = sshll.u32 %s683_s15, 6 }
  0x44   : > { %s958_s6 = scalar_select %p834_p5, 1, 0 }
  0x45   : > { %s430_s11 = sshll.u32 %s158_s10, 2  ;;  %s847_s17 = scalar_lea.hbm %s946_s0, %s431_s25 }
  0x46   : > { %s162_s21 = scalar_lea.vmem [#allocation2], %s430_s11  ;;  %p851_p11 = pnand %p483_p7, %p36_p9 }
  0x47   : > { %s169_s24 = sshll.u32 %s162_s21, 4  ;;  %s159_s27 = scalar_lea.sflag [#allocation3], %s158_s10  ;;  %s849_s24 = int_to_ptr.vmem [resolvable:$true] %s169_s24 }
  0x48   : > { %s583_s28 = scalar_lea.hbm %s847_s17, 64  ;;  %p585_p0 = pneg %p851_p11 }
  0x49   : > { %p584_p12 = scmp.ne.s32.totalorder %s847_s17, %s583_s28  ;;  %s588_s30 = scalar_lea.hbm %s946_s0, 128 }
  0x4a   : > { %p589_p13 = scmp.lt.u32.totalorder %s847_s17, %s946_s0  ;;  %p590_p6 = scmp.lt.u32.totalorder %s588_s30, %s583_s28 }
  0x4b   : > { %p586_p2 = pnand %p585_p0, %p584_p12  ;;  %p592_p3 = scmp.lt.u32.totalorder %s583_s28, %s847_s17 }
  0x4c   : > { %p591_p10 = por %p590_p6, %p589_p13 }
  0x4d   : > { %p587_p1 = pneg %p586_p2 }
  0x4e   : > { %p593_p7 = por %p592_p3, %p591_p10 }
  0x50   : > { %p594_p9 = pnand %p593_p7, %p587_p1 }
  0x52   : > { %597 = shalt.err (!%p594_p9)
}
  0x53   : > { %s598_s10 = scalar_lea.vmem %s849_s24, 64  ;;  %s689_s11 = smov [#allocation2]  }
  0x54   : > { %p599_p12 = scmp.ne.s32.totalorder %s849_s24, %s598_s10  ;;  %s603_s25 = sshll.u32 %s689_s11, 4  ;;  %s604_s25 = int_to_ptr.vmem [resolvable:$false] %s603_s25 }
  0x55   : > { %s605_s7 = scalar_lea.vmem %s604_s25, 128  ;;  %p606_p4 = scmp.lt.s32.totalorder %s849_s24, %s604_s25 }
  0x56   : > { %p601_p2 = pnand %p599_p12, %p585_p0  ;;  %p607_p13 = scmp.lt.s32.totalorder %s605_s7, %s598_s10 }
  0x58   : > { %p602_p5 = pneg %p601_p2  ;;  %p608_p6 = por %p607_p13, %p606_p4 }
  0x5a   : > { %p609_p10 = pnand %p608_p6, %p602_p5 }
  0x5c   : > { %612 = shalt.err (!%p609_p10)
}
  0x5d   : > { %476 = dma.hbm_to_vmem [thread:$0]  (!%p851_p11), %s847_s17, 64, %s849_s24, %s159_s27  }
  0x5e   : > { %178 = sbr.rel (%p754_p8) target bundleno = 338 (0x152), region = 32  ;;  %s883_s8 = sand.u32 (!%p754_p8), 1, %s675_s13  }
  0x5f   : > { %s433_s21 = sshll.u32 (!%p754_p8), %s883_s8, 2  ;;  %s181_s28 = scalar_lea.sflag (!%p754_p8), [#allocation3], %s883_s8 }
  0x60   : > { %s184_s22 = scalar_lea.vmem (!%p754_p8), [#allocation2], %s433_s21  ;;  %p960_p4 = scmp.ne.s32.totalorder (!%p754_p8), %s953_s18, 0 }
  0x65   : > { %658 = dma.done.wait (%p960_p4), %s181_s28, 64  }
  0x66   : > { %660 = vsyncadd (%p960_p4), %s181_s28, 4294967232  ;;  %p961_p5 = scmp.eq.s32.totalorder %s735_s16, 0 }
  0x68   : > { %662 = dma.done.wait (%p961_p5), [#allocation6], 512   ;;  %p962_p11 = pmov %p961_p5 }
  0x69   : > { %v690_v0 = vmov 0   ;;  %vm237_vm0 = vcmask 1043456   ;;  %vm230_vm1 = vcmask 31744   ;;  %v217_v1 = vld [vmem:[%s184_s22] sm:$0xf]  ;;  %v215_v2 = vld [vmem:[#allocation5] sm:$0xff] }
  0x6a   : > { %664 = vsyncadd (%p962_p11), [#allocation6], 4294966784  ;;  %526 = vset.pattern.permute.xlu0 %v690_v0  ;;  %v216_v3 = vld [vmem:[#allocation5 + $0x8] sm:$0xff]  ;;  %449 = vmatprep.subr.msk.mxu0 %vm237_vm0, %v217_v1  ;;  %v218_v4 = vld [vmem:[#allocation7] sm:$0xff]  ;;  %s436_s18 = sshll.u32 %s883_s8, 4  ;;  %s445_s24 = sshll.u32 %s735_s16, 8 }
  0x6b   : > { %451 = vmatprep.mubr.msk.f32.mxu0 %vm230_vm1, %v215_v2  ;;  %450 = vmatpush3.msk.msra.mxu0 %vm237_vm0, %v217_v1  ;;  %v219_v5 = vld [vmem:[#allocation7 + $0x8] sm:$0xff]  ;;  %s214_s20 = scalar_lea.vmem [#allocation8], %s436_s18  ;;  %vm316_vm2 = vcmask 523264   ;;  %s902_s29 = scalar_lea.hbm %s949_s3, %s445_s24 }
  0x6c   : > { %222 = vperm.xlu0 %526, %v218_v4   ;;  %452 = vmatmul.mubr.msk.f32.vlgmr.msra.gmra.mrb[0].mxu0 %vm230_vm1, %v216_v3  ;;  %s333_s17 = sshll.u32 %s214_s20, 4  ;;  %s320_s30 = scalar_lea.sflag [#allocation4], %s883_s8  ;;  %s897_s17 = int_to_ptr.vmem [resolvable:$true] %s333_s17 }
  0x6d   : > { %s613_s16 = scalar_lea.vmem %s897_s17, 256  ;;  %p963_p0 = scmp.ne.s32.totalorder %s958_s6, 0 }
  0x6e   : > { %p614_p8 = scmp.ne.s32.totalorder %s897_s17, %s613_s16  ;;  %s691_s23 = smov [#allocation8]  }
  0x6f   : > { %s617_s5 = sshll.u32 %s691_s23, 4  ;;  %s618_s5 = int_to_ptr.vmem [resolvable:$false] %s617_s5 }
  0x70   : > { %227 = vperm.xlu0 %526, %v219_v5   ;;  %p615_p1 = pnand %p614_p8, %p963_p0  ;;  %s619_s10 = scalar_lea.vmem %s618_s5, 512 }
  0x71   : > { %p620_p7 = scmp.lt.s32.totalorder %s897_s17, %s618_s5  ;;  %p621_p9 = scmp.lt.s32.totalorder %s619_s10, %s613_s16 }
  0x72   : > { %p616_p3 = pneg %p615_p1 }
  0x73   : > { %p622_p12 = por %p621_p9, %p620_p7 }
  0x75   : > { %p623_p2 = pnand %p622_p12, %p616_p3 }
  0xeb   : > { %v223_v6 = vpop.permute.xlu0 %222 }
  0xef   : > { %v228_v7 = vpop.permute.xlu0 %227 }
 0x13f   : > { %v453_v8 = vpop.f32.mrb[0].mxu0 }
 0x140   : > { %v313_v9 = vadd.f32 %v453_v8, %v228_v7  ;;  %v307_v10 = vpop.f32.mrb[1].mxu0 }
 0x141   : > { %v308_v11 = vadd.f32 %v307_v10, %v223_v6 }
 0x142   : > { %318 = vst.msk [vmem:[%s214_s20 + $0x8] sm:$0xff] %vm316_vm2, %v313_v9 }
 0x143   : > { %317 = vst.msk [vmem:[%s214_s20] sm:$0xff] %vm316_vm2, %v308_v11 }
 0x144   : > { %626 = shalt.err (!%p623_p2)
}
 0x145   : > { %s627_s11 = scalar_lea.hbm %s902_s29, 256  ;;  %s631_s21 = scalar_lea.hbm %s949_s3, 512 }
 0x146   : > { %p628_p13 = scmp.ne.s32.totalorder %s902_s29, %s627_s11  ;;  %p632_p4 = scmp.lt.u32.totalorder %s902_s29, %s949_s3 }
 0x147   : > { %p633_p5 = scmp.lt.u32.totalorder %s631_s21, %s627_s11  ;;  %p635_p8 = scmp.lt.u32.totalorder %s627_s11, %s902_s29 }
 0x148   : > { %p629_p6 = pnand %p628_p13, %p963_p0 }
 0x149   : > { %p634_p11 = por %p633_p5, %p632_p4 }
 0x14a   : > { %p630_p10 = pneg %p629_p6 }
 0x14b   : > { %p636_p1 = por %p635_p8, %p634_p11 }
 0x14d   : > { %p637_p3 = pnand %p636_p1, %p630_p10 }
 0x14f   : > { %640 = shalt.err (!%p637_p3)
}
 0x150   : > { %s692_s18 = smov 128   ;;  %s693_s20 = smov 8  }
 0x151   : > { %464 = dma.vmem_to_hbm [thread:$0]  (%p963_p0), %s897_s17, 256, %s902_s29, %s320_s30, %s692_s18, %s692_s18, %s693_s20  }
 0x152 PF: > { %s348_s24 = sand.u32 1, %s671_s12   ;;  %p964_p7 = scmp.ne.s32.totalorder %s954_s19, 0 }
 0x153   : > { %p965_p9 = scmp.ge.s32.totalorder %s683_s15, 2  ;;  %s349_s26 = scalar_lea.sflag [#allocation4], %s348_s24 }
 0x155   : > { %p478_p12 = pnand %p965_p9, %p964_p7 }
 0x157   : > { %666 = dma.done.wait (!%p478_p12), %s349_s26, 256  }
 0x158   : > { %668 = vsyncadd (!%p478_p12), %s349_s26, 4294967040  ;;  %p17_p2 = scmp.ge.s32.totalorder %s824_s4, 4   ;;  %s966_s12 = smov %s675_s13 }
 0x159   : > { %s967_s13 = smov %s679_s14  ;;  %s968_s14 = smov %s840_s9 }
 0x15a   : > { %s969_s15 = smov %s824_s4  ;;  %19 = sbr.rel (!%p17_p2) target bundleno = 6 (0x6), region = 85 }
 0x161   :  { %354 = vsyncpa [#allocation3], 1 }
 0x162   :  { %356 = vsyncpa [#allocation3 + $0x1], 1 }
 0x163   :  { %357 = vsyncpa [#allocation6], 1 }
 0x164   :  { %358 = vsyncpa [#allocation4], 1 }
 0x165   :  { %360 = vsyncpa [#allocation4 + $0x1], 1 }

// kernel: decoder_block_forward.3
= control target key start
LH: loop header
LB: loop body
LE: loop exit
PB: predicated region body
PF: predicated region fallthrough
CT: control target
= control target key end

     0   :  { %s2328_s0 = inlined_call_operand.hbm [shape: f32[2,4,256], index: 0, kind: input, shape index: {}]   ;;  %s2329_s1 = inlined_call_operand.hbm [shape: f32[2,4,256], index: 1, kind: input, shape index: {}]   ;;  %s2330_s2 = inlined_call_operand.hbm [shape: f32[9,256], index: 2, kind: input, shape index: {}]   ;;  %s2331_s3 = inlined_call_operand.hbm [shape: f32[4,72], index: 3, kind: input, shape index: {}]   ;;  %s2332_s4 = inlined_call_operand.hbm [shape: f32[4,1], index: 4, kind: input, shape index: {}]   ;;  %s2333_s5 = inlined_call_operand.hbm [shape: f32[4,1], index: 5, kind: input, shape index: {}]   ;;  %s2334_s6 = inlined_call_operand.hbm [shape: f32[4,36], index: 6, kind: input, shape index: {}]   ;;  %s2335_s7 = inlined_call_operand.hbm [shape: f32[4,1], index: 7, kind: input, shape index: {}]   ;;  %s2336_s8 = inlined_call_operand.hbm [shape: f32[4,1], index: 8, kind: input, shape index: {}]   ;;  %s2337_s9 = inlined_call_operand.hbm [shape: f32[2,4,256], index: 9, kind: output, shape index: {}]  }
   0x1   :  { %2343 = sst [smem:[#allocation25_spill]] %s2330_s2 }
   0x2   :  { %2344 = sst [smem:[#allocation26_spill]] %s2331_s3 }
   0x3   :  { %2345 = sst [smem:[#allocation27_spill]] %s2332_s4 }
   0x4   :  { %2346 = sst [smem:[#allocation28_spill]] %s2333_s5 }
   0x5   :  { %2347 = sst [smem:[#allocation29_spill]] %s2334_s6 }
   0x6   :  { %2348 = sst [smem:[#allocation30_spill]] %s2337_s9 }
   0x7   :  { %14 = vsyncpa [#allocation3], 0 }
   0x8   :  { %16 = vsyncpa [#allocation3 + $0x1], 0 }
   0x9   :  { %17 = vsyncpa [#allocation6], 0 }
   0xa   :  { %19 = vsyncpa [#allocation6 + $0x1], 0 }
   0xb   :  { %20 = vsyncpa [#allocation9], 0 }
   0xc   :  { %21 = vsyncpa [#allocation12], 0 }
   0xd   :  { %22 = vsyncpa [#allocation15], 0 }
   0xe   :  { %23 = vsyncpa [#allocation4], 0 }
   0xf   :  { %25 = vsyncpa [#allocation4 + $0x1], 0  ;;  %s1751_s30 = smov 0   ;;  %s1753_s10 = smov 0  }
  0x10   :  { %s1755_s11 = smov 0   ;;  %s1757_s12 = smov 0  }
  0x11 LB: > { %s1679_s13 = smov [#allocation7]   ;;  %s1772_s15 = sadd.s32 4294967295, %s1677_s12   ;;  %s1677_s12 = sphi %s1757_s12, %s2379_s12   ;;  %s1673_s11 = sphi %s1755_s11, %s2378_s11   ;;  %s1669_s10 = sphi %s1753_s10, %s2377_s10   ;;  %s1665_s30 = sphi %s1751_s30, %s2376_s30  }
  0x12   : > { %s273_s14 = sshll.u32 %s1679_s13, 4  ;;  %p1133_p0 = scmp.ge.s32.totalorder %s1677_s12, 1  ;;  %s1777_s14 = int_to_ptr.vmem [resolvable:$true] %s273_s14 }
  0x13   : > { %p2339_p1 = scmp.eq.s32.totalorder %s1772_s15, 0  ;;  %p261_p2 = scmp.lt.s32.totalorder %s1677_s12, 3 }
  0x14   : > { %s1680_s17 = smov [#allocation8]   ;;  %s1681_s20 = smov [#allocation11]  }
  0x15   : > { %p1779_p3 = pnand %p1133_p0, %p261_p2  ;;  %s287_s18 = sshll.u32 %s1680_s17, 4  ;;  %s1792_s18 = int_to_ptr.vmem [resolvable:$true] %s287_s18 }
  0x16   : > { %s309_s21 = sshll.u32 %s1681_s20, 4  ;;  %s2351_s2 = sld [smem:[#allocation25_spill]]  ;;  %s1794_s21 = int_to_ptr.vmem [resolvable:$true] %s309_s21 }
  0x17   : > { %s2349_s16 = scalar_select %p1779_p3, 1, 0 }
  0x18   : > { %p1231_p5 = pneg %p1779_p3 }
  0x1a   : > { %p1788_p6 = pnand %p1231_p5, %p2339_p1 }
  0x1c   : > { %s1335_s24 = scalar_lea.hbm %s2351_s2, 512  ;;  %p1804_p8 = pneg %p1788_p6 }
  0x1d   : > { %p1336_p7 = scmp.ne.s32.totalorder %s2351_s2, %s1335_s24  ;;  %p1342_p11 = scmp.lt.u32.totalorder %s1335_s24, %s2351_s2 }
  0x1f   : > { %p1338_p9 = pnand %p1804_p8, %p1336_p7 }
  0x21   : > { %p1339_p10 = pneg %p1338_p9 }
  0x23   : > { %p1344_p12 = pnand %p1342_p11, %p1339_p10 }
  0x25   : > { %1347 = shalt.err (!%p1344_p12)
}
  0x26   : > { %s1348_s13 = scalar_lea.vmem %s1777_s14, 512  ;;  %p1356_p5 = scmp.lt.s32.totalorder %s1777_s14, %s1777_s14 }
  0x27   : > { %p1349_p13 = scmp.ne.s32.totalorder %s1777_s14, %s1348_s13  ;;  %p1357_p4 = scmp.lt.s32.totalorder %s1348_s13, %s1348_s13 }
  0x29   : > { %p1351_p0 = pnand %p1349_p13, %p1804_p8  ;;  %p1358_p7 = por %p1357_p4, %p1356_p5 }
  0x2b   : > { %p1352_p2 = pneg %p1351_p0 }
  0x2d   : > { %p1359_p9 = pnand %p1358_p7, %p1352_p2 }
  0x2f   : > { %1362 = shalt.err (!%p1359_p9)
}
  0x30   : > { %s1682_s17 = smov 256   ;;  %s1683_s20 = smov 16  }
  0x31   : > { %1234 = dma.hbm_to_vmem [thread:$0]  (!%p1788_p6), %s2351_s2, 512, %s1777_s14, [#allocation6], %s1682_s17, %s1682_s17, %s1683_s20  }
  0x32   : > { %s2353_s3 = sld [smem:[#allocation26_spill]] }
  0x38   : > { %s1363_s26 = scalar_lea.hbm %s2353_s3, 64 }
  0x39   : > { %p1364_p4 = scmp.ne.s32.totalorder %s2353_s3, %s1363_s26  ;;  %p1370_p12 = scmp.lt.u32.totalorder %s1363_s26, %s2353_s3 }
  0x3b   : > { %p1366_p10 = pnand %p1364_p4, %p1804_p8 }
  0x3d   : > { %p1367_p11 = pneg %p1366_p10 }
  0x3f   : > { %p1372_p13 = pnand %p1370_p12, %p1367_p11 }
  0x41   : > { %1375 = shalt.err (!%p1372_p13)
}
  0x42   : > { %s1376_s14 = scalar_lea.vmem %s1792_s18, 64  ;;  %p1384_p7 = scmp.lt.s32.totalorder %s1792_s18, %s1792_s18 }
  0x43   : > { %p1377_p0 = scmp.ne.s32.totalorder %s1792_s18, %s1376_s14  ;;  %p1385_p9 = scmp.lt.s32.totalorder %s1376_s14, %s1376_s14 }
  0x45   : > { %p1379_p2 = pnand %p1377_p0, %p1804_p8  ;;  %p1386_p4 = por %p1385_p9, %p1384_p7 }
  0x47   : > { %p1380_p5 = pneg %p1379_p2 }
  0x49   : > { %p1387_p10 = pnand %p1386_p4, %p1380_p5 }
  0x4b   : > { %1390 = shalt.err (!%p1387_p10)
}
  0x4c   : > { %1237 = dma.hbm_to_vmem [thread:$0]  (!%p1788_p6), %s2353_s3, 64, %s1792_s18, [#allocation9]  }
  0x4d   : > { %s2354_s5 = sld [smem:[#allocation28_spill]] }
  0x53   : > { %s1391_s23 = scalar_lea.hbm %s2354_s5, 64 }
  0x54   : > { %p1392_p11 = scmp.ne.s32.totalorder %s2354_s5, %s1391_s23  ;;  %p1398_p0 = scmp.lt.u32.totalorder %s1391_s23, %s2354_s5 }
  0x56   : > { %p1394_p12 = pnand %p1392_p11, %p1804_p8 }
  0x58   : > { %p1395_p13 = pneg %p1394_p12 }
  0x5a   : > { %p1400_p2 = pnand %p1398_p0, %p1395_p13 }
  0x5c   : > { %1403 = shalt.err (!%p1400_p2)
}
  0x5d   : > { %s1404_s18 = scalar_lea.vmem %s1794_s21, 64  ;;  %p1412_p4 = scmp.lt.s32.totalorder %s1794_s21, %s1794_s21 }
  0x5e   : > { %p1405_p5 = scmp.ne.s32.totalorder %s1794_s21, %s1404_s18  ;;  %p1413_p10 = scmp.lt.s32.totalorder %s1404_s18, %s1404_s18 }
  0x60   : > { %p1407_p7 = pnand %p1405_p5, %p1804_p8  ;;  %p1414_p11 = por %p1413_p10, %p1412_p4 }
  0x62   : > { %p1408_p9 = pneg %p1407_p7 }
  0x64   : > { %p1415_p12 = pnand %p1414_p11, %p1408_p9 }
  0x66   : > { %1418 = shalt.err (!%p1415_p12)
}
  0x67   : > { %1243 = dma.hbm_to_vmem [thread:$0]  (!%p1788_p6), %s2354_s5, 64, %s1794_s21, [#allocation12]  }
  0x68   : > { %s1684_s14 = smov [#allocation14]   ;;  %s1685_s17 = smov [#allocation10]  }
  0x69   : > { %s331_s9 = sshll.u32 %s1684_s14, 4  ;;  %s298_s20 = sshll.u32 %s1685_s17, 4  ;;  %s332_s9 = int_to_ptr.vmem [resolvable:$true] %s331_s9  ;;  %s299_s20 = int_to_ptr.vmem [resolvable:$true] %s298_s20 }
  0x6a   : > { %s1419_s24 = scalar_lea.hbm %s2335_s7, 64 }
  0x6b   : > { %p1420_p13 = scmp.ne.s32.totalorder %s2335_s7, %s1419_s24  ;;  %p1426_p5 = scmp.lt.u32.totalorder %s1419_s24, %s2335_s7 }
  0x6d   : > { %p1422_p0 = pnand %p1420_p13, %p1804_p8 }
  0x6f   : > { %p1423_p2 = pneg %p1422_p0 }
  0x71   : > { %p1428_p7 = pnand %p1426_p5, %p1423_p2 }
  0x73   : > { %1431 = shalt.err (!%p1428_p7)
}
  0x74   : > { %s1432_s21 = scalar_lea.vmem %s332_s9, 64  ;;  %p1440_p11 = scmp.lt.s32.totalorder %s332_s9, %s332_s9 }
  0x75   : > { %p1433_p9 = scmp.ne.s32.totalorder %s332_s9, %s1432_s21  ;;  %p1441_p12 = scmp.lt.s32.totalorder %s1432_s21, %s1432_s21 }
  0x77   : > { %p1435_p4 = pnand %p1433_p9, %p1804_p8  ;;  %p1442_p1 = por %p1441_p12, %p1440_p11 }
  0x79   : > { %p1436_p10 = pneg %p1435_p4 }
  0x7b   : > { %p1443_p3 = pnand %p1442_p1, %p1436_p10 }
  0x7d   : > { %1446 = shalt.err (!%p1443_p3)
}
  0x7e   : > { %1249 = dma.hbm_to_vmem [thread:$0]  (!%p1788_p6), %s2335_s7, 64, %s332_s9, [#allocation15]  }
  0x7f   : > { %s2355_s4 = sld [smem:[#allocation27_spill]] }
  0x85   : > { %s1447_s22 = scalar_lea.hbm %s2355_s4, 64 }
  0x86   : > { %p1448_p13 = scmp.ne.s32.totalorder %s2355_s4, %s1447_s22  ;;  %p1454_p3 = scmp.lt.u32.totalorder %s1447_s22, %s2355_s4 }
  0x88   : > { %p1450_p0 = pnand %p1448_p13, %p1804_p8 }
  0x8a   : > { %p1451_p1 = pneg %p1450_p0 }
  0x8c   : > { %p1456_p2 = pnand %p1454_p3, %p1451_p1 }
  0x8e   : > { %1459 = shalt.err (!%p1456_p2)
}
  0x8f   : > { %s1460_s28 = scalar_lea.vmem %s299_s20, 64  ;;  %p1468_p4 = scmp.lt.s32.totalorder %s299_s20, %s299_s20 }
  0x90   : > { %p1461_p5 = scmp.ne.s32.totalorder %s299_s20, %s1460_s28  ;;  %p1469_p10 = scmp.lt.s32.totalorder %s1460_s28, %s1460_s28 }
  0x92   : > { %p1463_p7 = pnand %p1461_p5, %p1804_p8  ;;  %p1470_p11 = por %p1469_p10, %p1468_p4 }
  0x94   : > { %p1464_p9 = pneg %p1463_p7 }
  0x96   : > { %p1471_p12 = pnand %p1470_p11, %p1464_p9 }
  0x98   : > { %1474 = shalt.err (!%p1471_p12)
}
  0x99   : > { %1240 = dma.hbm_to_vmem [thread:$0]  (!%p1788_p6), %s2355_s4, 64, %s299_s20, [#allocation9]  }
  0x9a   : > { %s1686_s21 = smov [#allocation13]   ;;  %s1687_s13 = smov [#allocation16]  }
  0x9b   : > { %s320_s29 = sshll.u32 %s1686_s21, 4  ;;  %s342_s14 = sshll.u32 %s1687_s13, 4  ;;  %s321_s29 = int_to_ptr.vmem [resolvable:$true] %s320_s29  ;;  %s343_s14 = int_to_ptr.vmem [resolvable:$true] %s342_s14 }
  0x9c   : > { %s2356_s6 = sld [smem:[#allocation29_spill]] }
  0xa2   : > { %s1475_s23 = scalar_lea.hbm %s2356_s6, 64 }
  0xa3   : > { %p1476_p13 = scmp.ne.s32.totalorder %s2356_s6, %s1475_s23  ;;  %p1482_p3 = scmp.lt.u32.totalorder %s1475_s23, %s2356_s6 }
  0xa5   : > { %p1478_p0 = pnand %p1476_p13, %p1804_p8 }
  0xa7   : > { %p1479_p1 = pneg %p1478_p0 }
  0xa9   : > { %p1484_p2 = pnand %p1482_p3, %p1479_p1 }
  0xab   : > { %1487 = shalt.err (!%p1484_p2)
}
  0xac   : > { %s1488_s20 = scalar_lea.vmem %s321_s29, 64  ;;  %p1496_p4 = scmp.lt.s32.totalorder %s321_s29, %s321_s29 }
  0xad   : > { %p1489_p5 = scmp.ne.s32.totalorder %s321_s29, %s1488_s20  ;;  %p1497_p10 = scmp.lt.s32.totalorder %s1488_s20, %s1488_s20 }
  0xaf   : > { %p1491_p7 = pnand %p1489_p5, %p1804_p8  ;;  %p1498_p11 = por %p1497_p10, %p1496_p4 }
  0xb1   : > { %p1492_p9 = pneg %p1491_p7 }
  0xb3   : > { %p1499_p12 = pnand %p1498_p11, %p1492_p9 }
  0xb5   : > { %1502 = shalt.err (!%p1499_p12)
}
  0xb6   : > { %1246 = dma.hbm_to_vmem [thread:$0]  (!%p1788_p6), %s2356_s6, 64, %s321_s29, [#allocation12]  }
  0xb7   : > { %s1503_s17 = scalar_lea.hbm %s2336_s8, 64 }
  0xb8   : > { %p1504_p13 = scmp.ne.s32.totalorder %s2336_s8, %s1503_s17  ;;  %p1510_p3 = scmp.lt.u32.totalorder %s1503_s17, %s2336_s8 }
  0xba   : > { %p1506_p0 = pnand %p1504_p13, %p1804_p8 }
  0xbc   : > { %p1507_p1 = pneg %p1506_p0 }
  0xbe   : > { %p1512_p2 = pnand %p1510_p3, %p1507_p1 }
  0xc0   : > { %1515 = shalt.err (!%p1512_p2)
}
  0xc1   : > { %s1516_s26 = scalar_lea.vmem %s343_s14, 64  ;;  %p1524_p4 = scmp.lt.s32.totalorder %s343_s14, %s343_s14 }
  0xc2   : > { %p1517_p5 = scmp.ne.s32.totalorder %s343_s14, %s1516_s26  ;;  %p1525_p10 = scmp.lt.s32.totalorder %s1516_s26, %s1516_s26 }
  0xc4   : > { %p1519_p7 = pnand %p1517_p5, %p1804_p8  ;;  %p1526_p11 = por %p1525_p10, %p1524_p4 }
  0xc6   : > { %p1520_p9 = pneg %p1519_p7 }
  0xc8   : > { %p1527_p12 = pnand %p1526_p11, %p1520_p9 }
  0xca   : > { %1530 = shalt.err (!%p1527_p12)
}
  0xcb   : > { %1252 = dma.hbm_to_vmem [thread:$0]  (!%p1788_p6), %s2336_s8, 64, %s343_s14, [#allocation15]  }
  0xcc   : > { %s1132_s27 = sadd.s32 4294967294, %s1677_s12   ;;  %s1945_s19 = sadd.s32 1, %s1677_s12  }
  0xcd   : > { %s38_s20 = sadd.s32 1, %s1673_s11  ;;  %s35_s9 = ssub.s32 %s1677_s12, %s1945_s19 }
  0xce   : > { %p45_p8 = scmp.ne.s32.totalorder %s1673_s11, %s1669_s10  ;;  %p36_p13 = scmp.eq.s32.totalorder %s35_s9, 0 }
  0xcf   : > { %p46_p0 = scmp.eq.s32.totalorder %s1677_s12, 0  ;;  %p51_p1 = scmp.ne.s32.totalorder %s1669_s10, %s1665_s30 }
  0xd0   : > { %p248_p3 = scmp.eq.s32.totalorder %s1772_s15, 1  ;;  %p2357_p5 = scmp.eq.s32.totalorder %s1772_s15, 0 }
  0xd1   : > { %s1957_s18 = scalar_select %p36_p13, %s1673_s11, %s38_s20  }
  0xd2   : > { %p47_p2 = por %p46_p0, %p45_p8  ;;  %p1961_p7 = por %p2357_p5, %p51_p1 }
  0xd3   : > { %p1965_p6 = por %p248_p3, %p45_p8  ;;  %p254_p9 = scmp.eq.s32.totalorder %s1132_s27, 1 }
  0xd4   : > { %s2358_s21 = scalar_select %p1961_p7, 1, 0 }
  0xd5   : > { %s2359_s14 = scalar_select %p1965_p6, 1, 0 }
  0xd6   : > { %p1271_p4 = scmp.lt.s32.totalorder %s1677_s12, 2  ;;  %s353_s13 = sand.u32 1, %s1673_s11  }
  0xd7   : > { %p1971_p10 = por %p254_p9, %p51_p1  ;;  %s1975_s22 = sshll.u32 %s353_s13, 3 }
  0xd8   : > { %s1170_s23 = sshll.u32 %s1677_s12, 7  ;;  %s357_s29 = scalar_lea.vmem [#allocation2], %s1975_s22 }
  0xd9   : > { %s2360_s17 = scalar_select %p1971_p10, 1, 0 }
  0xda   : > { %s1981_s26 = scalar_lea.hbm %s2328_s0, %s1170_s23  ;;  %s365_s28 = sshll.u32 %s357_s29, 4  ;;  %s1988_s28 = int_to_ptr.vmem [resolvable:$true] %s365_s28 }
  0xdb   : > { %p1984_p11 = pnand %p1271_p4, %p47_p2  ;;  %s1993_s24 = scalar_lea.hbm %s2329_s1, %s1170_s23 }
  0xdc   : > { %s354_s25 = scalar_lea.sflag [#allocation3], %s353_s13  ;;  %s1531_s2 = scalar_lea.hbm %s1981_s26, 128 }
  0xdd   : > { %p1532_p12 = scmp.ne.s32.totalorder %s1981_s26, %s1531_s2  ;;  %p1533_p8 = pneg %p1984_p11 }
  0xde   : > { %s1536_s4 = scalar_lea.hbm %s2328_s0, 256  ;;  %p1537_p1 = scmp.lt.u32.totalorder %s1981_s26, %s2328_s0 }
  0xdf   : > { %p1534_p13 = pnand %p1533_p8, %p1532_p12  ;;  %p1538_p3 = scmp.lt.u32.totalorder %s1536_s4, %s1531_s2 }
  0xe0   : > { %p1540_p5 = scmp.lt.u32.totalorder %s1531_s2, %s1981_s26 }
  0xe1   : > { %p1535_p0 = pneg %p1534_p13  ;;  %p1539_p2 = por %p1538_p3, %p1537_p1 }
  0xe3   : > { %p1541_p9 = por %p1540_p5, %p1539_p2 }
  0xe5   : > { %p1542_p4 = pnand %p1541_p9, %p1535_p0 }
  0xe7   : > { %1545 = shalt.err (!%p1542_p4)
}
  0xe8   : > { %s1546_s13 = scalar_lea.vmem %s1988_s28, 128  ;;  %s1688_s3 = smov [#allocation2]  }
  0xe9   : > { %p1547_p12 = scmp.ne.s32.totalorder %s1988_s28, %s1546_s13  ;;  %s1551_s23 = sshll.u32 %s1688_s3, 4  ;;  %s1552_s23 = int_to_ptr.vmem [resolvable:$false] %s1551_s23 }
  0xea   : > { %s1553_s5 = scalar_lea.vmem %s1552_s23, 256  ;;  %p1554_p6 = scmp.lt.s32.totalorder %s1988_s28, %s1552_s23 }
  0xeb   : > { %p1549_p13 = pnand %p1547_p12, %p1533_p8  ;;  %p1555_p1 = scmp.lt.s32.totalorder %s1553_s5, %s1546_s13 }
  0xed   : > { %p1550_p10 = pneg %p1549_p13  ;;  %p1556_p3 = por %p1555_p1, %p1554_p6 }
  0xef   : > { %p1557_p2 = pnand %p1556_p3, %p1550_p10 }
  0xf1   : > { %1560 = shalt.err (!%p1557_p2)
}
  0xf2   : > { %1256 = dma.hbm_to_vmem [thread:$0]  (!%p1984_p11), %s1981_s26, 128, %s1988_s28, %s354_s25  }
  0xf3   : > { %s372_s2 = sand.u32 1, %s1677_s12   ;;  %s376_s4 = scalar_lea.vmem [#allocation5], %s1975_s22 }
  0xf4   : > { %s384_s6 = sshll.u32 %s376_s4, 4  ;;  %s373_s20 = scalar_lea.sflag [#allocation6], %s372_s2  ;;  %s385_s6 = int_to_ptr.vmem [resolvable:$true] %s384_s6 }
  0xf5   : > { %s1561_s9 = scalar_lea.hbm %s1993_s24, 128  ;;  %s1566_s3 = scalar_lea.hbm %s2329_s1, 256 }
  0xf6   : > { %p1562_p6 = scmp.ne.s32.totalorder %s1993_s24, %s1561_s9  ;;  %p1567_p5 = scmp.lt.u32.totalorder %s1993_s24, %s2329_s1 }
  0xf7   : > { %p1568_p9 = scmp.lt.u32.totalorder %s1566_s3, %s1561_s9  ;;  %p1570_p12 = scmp.lt.u32.totalorder %s1561_s9, %s1993_s24 }
  0xf8   : > { %p1564_p10 = pnand %p1562_p6, %p1533_p8 }
  0xf9   : > { %p1569_p4 = por %p1568_p9, %p1567_p5 }
  0xfa   : > { %p1565_p0 = pneg %p1564_p10 }
  0xfb   : > { %p1571_p13 = por %p1570_p12, %p1569_p4 }
  0xfd   : > { %p1572_p1 = pnand %p1571_p13, %p1565_p0 }
  0xff   : > { %1575 = shalt.err (!%p1572_p1)
}
 0x100   : > { %s1576_s22 = scalar_lea.vmem %s385_s6, 128  ;;  %s1689_s26 = smov [#allocation5]  }
 0x101   : > { %p1577_p3 = scmp.ne.s32.totalorder %s385_s6, %s1576_s22  ;;  %s1581_s28 = sshll.u32 %s1689_s26, 4  ;;  %s1582_s28 = int_to_ptr.vmem [resolvable:$false] %s1581_s28 }
 0x102   : > { %s1583_s25 = scalar_lea.vmem %s1582_s28, 256  ;;  %p1584_p10 = scmp.lt.s32.totalorder %s385_s6, %s1582_s28 }
 0x103   : > { %p1579_p2 = pnand %p1577_p3, %p1533_p8  ;;  %p1585_p7 = scmp.lt.s32.totalorder %s1583_s25, %s1576_s22 }
 0x105   : > { %p1580_p6 = pneg %p1579_p2  ;;  %p1586_p5 = por %p1585_p7, %p1584_p10 }
 0x107   : > { %p1587_p9 = pnand %p1586_p5, %p1580_p6 }
 0x109   : > { %1590 = shalt.err (!%p1587_p9)
}
 0x10a   : > { %1259 = dma.hbm_to_vmem [thread:$0]  (!%p1984_p11), %s1993_s24, 128, %s385_s6, %s373_s20  }
 0x10b   : > { %p2362_p0 = scmp.ne.s32.totalorder %s2349_s16, 0 }
 0x10c   : > { %s2044_s2 = sand.u32 (!%p2362_p0), 1, %s1669_s10   ;;  %p2363_p7 = scmp.ne.s32.totalorder (!%p2362_p0), %s2358_s21, 0 }
 0x10d   : > { %393 = sbr.rel (%p2362_p0) target bundleno = 1051 (0x41b), region = 56  ;;  %s2047_s4 = sshll.u32 (!%p2362_p0), %s2044_s2, 3 }
 0x10e   : > { %s396_s9 = scalar_lea.sflag (!%p2362_p0), [#allocation3], %s2044_s2  ;;  %s399_s29 = scalar_lea.vmem (!%p2362_p0), [#allocation2], %s2047_s4 }
 0x114   : > { %1636 = dma.done.wait (%p2363_p7), %s396_s9, 128  }
 0x115   : > { %1638 = vsyncadd (%p2363_p7), %s396_s9, 4294967168  ;;  %s404_s16 = sand.u32 1, %s1772_s15   ;;  %s408_s24 = scalar_lea.vmem [#allocation5], %s2047_s4 }
 0x116   : > { %s405_s27 = scalar_lea.sflag [#allocation6], %s404_s16 }
 0x117   : > { %1640 = dma.done.wait (%p2363_p7), %s405_s27, 128  }
 0x118   : > { %1642 = vsyncadd (%p2363_p7), %s405_s27, 4294967168  ;;  %p2364_p11 = scmp.eq.s32.totalorder %s1772_s15, 0 }
 0x11a   : > { %1644 = dma.done.wait (%p2364_p11), [#allocation6], 512   ;;  %p2365_p8 = pmov %p2364_p11 }
 0x11c   : > { %1646 = vsyncadd (%p2365_p8), [#allocation6], 4294966784  ;;  %p2366_p4 = pmov %p2365_p8 }
 0x11e   : > { %1648 = dma.done.wait (%p2366_p4), [#allocation9], 128   ;;  %p2367_p12 = pmov %p2366_p4 }
 0x11f   : > { %p2368_p13 = pmov %p2366_p4 }
 0x120   : > { %1650 = vsyncadd (%p2367_p12), [#allocation9], 4294967168 }
 0x121   : > { %1652 = dma.done.wait (%p2368_p13), [#allocation12], 128   ;;  %p2369_p1 = pmov %p2366_p4 }
 0x123   : > { %1654 = vsyncadd (%p2369_p1), [#allocation12], 4294967168  ;;  %p2370_p3 = pmov %p2369_p1 }
 0x124   : > { %p2371_p2 = pmov %p2369_p1 }
 0x125   : > { %1656 = dma.done.wait (%p2370_p3), [#allocation15], 128  }
 0x126   : > { %1658 = vsyncadd (%p2371_p2), [#allocation15], 4294967168  ;;  %v480_v0 = vld [vmem:[%s399_s29] sm:$0xff]  ;;  %v481_v1 = vld [vmem:[%s408_s24] sm:$0xff]  ;;  %vm488_vm0 = vcmask 1043456   ;;  %s1690_s21 = smov 16   ;;  %v502_v10 = vlaneseq }
 0x127   : > { %v486_v2 = vcombine.low %v481_v1, %v481_v1  ;;  %v483_v3 = vcombine.high %v480_v0, %v480_v0  ;;  %s1691_s6 = smov 17   ;;  %s1692_s20 = smov 15   ;;  %v1697_v6 = vmov 0.0   ;;  %v1698_v7 = vmov 0   ;;  %v721_v8 = vld [vmem:[#allocation10] sm:$0xf] }
 0x128   : > { %s1693_s13 = smov 1   ;;  %s1694_s3 = smov 127   ;;  %714 = vmatprep.mubr.f32.mxu0 %v1697_v6  ;;  %928 = vmatprep.mubr.f32.mxu1 %v1697_v6  ;;  %v729_v9 = vld [vmem:[#allocation11] sm:$0xf]  ;;  %v2115_v11 = vshrl.u32 %v502_v10, 7  ;;  %v2119_v14 = vld [vmem:[#allocation7] sm:$0xff] }
 0x129   : > { %v2078_v4 = vsel %vm488_vm0, %v480_v0, %v486_v2  ;;  %v2085_v5 = vsel %vm488_vm0, %v483_v3, %v481_v1  ;;  %s1695_s23 = smov 112   ;;  %s1696_s5 = smov 113   ;;  %1331 = vset.pattern.permute.xlu0 %v1698_v7  ;;  %1332 = vset.pattern.permute.xlu1 %v1698_v7  ;;  %vm516_vm1 = vcmask 130048   ;;  %vm497_vm2 = vcmask 138240   ;;  %v477_v15 = vld [vmem:[#allocation7 + $0x8] sm:$0xff] }
 0x12a   : > { %512 = vrot.lane.b32.xlu1 %v2078_v4, %s1690_s21  ;;  %493 = vrot.lane.b32.xlu0 %v2078_v4, %s1691_s6  ;;  %s1699_s22 = smov 111   ;;  %v523_v12 = vsub.s32 1, %v2115_v11  ;;  %v504_v13 = vsub.s32 0, %v2115_v11  ;;  %v542_v26 = vsub.s32 2, %v2115_v11  ;;  %v561_v33 = vsub.s32 3, %v2115_v11  ;;  %s1172_s26 = sshll.u32 %s1772_s15, 7 }
 0x12b   : > { %vm535_vm3 = vcmask 121856   ;;  %v580_v37 = vsub.s32 5, %v2115_v11  ;;  %vm554_vm4 = vcmask 7168   ;;  %vm573_vm5 = vcmask 1039360   ;;  %s475_s28 = scalar_lea.vmem [#allocation17], %s2047_s4  ;;  %s2372_s16 = sld [smem:[#allocation30_spill]] }
 0x12c   : > { %v2122_v18 = vrot.slane %v2119_v14, %v523_v12  ;;  %v2125_v19 = vrot.slane %v2119_v14, %v504_v13  ;;  %v2129_v22 = vrot.slane %v477_v15, %v504_v13  ;;  %v2131_v23 = vrot.slane %v477_v15, %v523_v12  ;;  %s973_s25 = sshll.u32 %s475_s28, 4  ;;  %s959_s24 = scalar_lea.sflag [#allocation4], %s2044_s2  ;;  %s2286_s25 = int_to_ptr.vmem [resolvable:$true] %s973_s25 }
 0x12d   : > { %v2143_v38 = vrot.slane %v2119_v14, %v542_v26  ;;  %v2145_v40 = vrot.slane %v477_v15, %v542_v26  ;;  %v2148_v41 = vrot.slane %v2119_v14, %v561_v33  ;;  %v2150_v42 = vrot.slane %v477_v15, %v561_v33  ;;  %v2193_v26 = vld [vmem:[#allocation7 + $0x18] ss:$0 sm:$0xff]  ;;  %v645_v33 = vld [vmem:[#allocation8] sm:$0xf]  ;;  %p2373_p10 = scmp.ne.s32.totalorder %s2359_s14, 0  ;;  %s1700_s15 = smov [#allocation17]  }
 0x12e   : > { %514 = vrot.lane.b32.xlu1 %v2085_v5, %s1690_s21  ;;  %495 = vrot.lane.b32.xlu0 %v2085_v5, %s1691_s6  ;;  %v2155_v47 = vrot.slane %v2119_v14, %v580_v37  ;;  %v2157_v48 = vrot.slane %v477_v15, %v580_v37  ;;  %v618_v51 = vsub.s32 7, %v2115_v11  ;;  %v599_v52 = vsub.s32 6, %v2115_v11  ;;  %s1595_s4 = sshll.u32 %s1700_s15, 4  ;;  %s1596_s4 = int_to_ptr.vmem [resolvable:$false] %s1595_s4 }
 0x12f   : > { %vm611_vm6 = vcmask 916480   ;;  %vm592_vm7 = vcmask 924672   ;;  %vm630_vm8 = vcmask 908288   ;;  %vm646_vm9 = vcmask 588800   ;;  %p1598_p0 = scmp.lt.s32.totalorder %s2286_s25, %s1596_s4 }
 0x130   : > { %v2169_v63 = vrot.slane %v477_v15, %v618_v51  ;;  %v2173_v2 = vrot.slane %v477_v15, %v599_v52  ;;  %v2182_v13 = vrot.slane %v2119_v14, %v618_v51  ;;  %v2185_v15 = vrot.slane %v2119_v14, %v599_v52  ;;  %v943_v51 = vld [vmem:[#allocation16] sm:$0xf] }
 0x131   : > { %vm854_vm10 = vcmask 293888   ;;  %s2284_s27 = scalar_lea.hbm %s2372_s16, %s1172_s26 }
 0x132   : > { %533 = vrot.lane.b32.xlu1 %v2085_v5, %s1692_s20  ;;  %531 = vrot.lane.b32.xlu0 %v2078_v4, %s1692_s20 }
 0x136   : > { %552 = vrot.lane.b32.xlu1 %v2085_v5, %s1693_s13  ;;  %550 = vrot.lane.b32.xlu0 %v2078_v4, %s1693_s13 }
 0x13a   : > { %569 = vrot.lane.b32.xlu1 %v2078_v4, %s1694_s3  ;;  %571 = vrot.lane.b32.xlu0 %v2085_v5, %s1694_s3 }
 0x13e   : > { %609 = vrot.lane.b32.xlu1 %v2085_v5, %s1695_s23  ;;  %590 = vrot.lane.b32.xlu0 %v2085_v5, %s1696_s5 }
 0x142   : > { %607 = vrot.lane.b32.xlu1 %v2078_v4, %s1695_s23  ;;  %588 = vrot.lane.b32.xlu0 %v2078_v4, %s1696_s5 }
 0x146   : > { %626 = vrot.lane.b32.xlu1 %v2078_v4, %s1699_s22  ;;  %628 = vrot.lane.b32.xlu0 %v2085_v5, %s1699_s22 }
 0x14a   : > { %724 = vperm.xlu0 %1331, %v721_v8   ;;  %732 = vperm.xlu1 %1332, %v729_v9  }
 0x19c   : > { %v513_v16 = vpop.permute.xlu1 %512  ;;  %v494_v17 = vpop.permute.xlu0 %493 }
 0x19d   : > { %v520_v20 = vsel %vm516_vm1, 0.0, %v513_v16  ;;  %v501_v21 = vsel %vm497_vm2, 0.0, %v494_v17 }
 0x19e   : > { %v529_v27 = vmul.f32 %v2122_v18, %v520_v20  ;;  %v510_v28 = vmul.f32 %v2125_v19, %v501_v21 }
 0x1a0   : > { %v515_v24 = vpop.permute.xlu1 %514  ;;  %v496_v25 = vpop.permute.xlu0 %495  ;;  %v1175_v39 = vpack.c.bf16 %v529_v27, %v510_v28 }
 0x1a1   : > { %v517_v29 = vsel %vm516_vm1, %v513_v16, %v515_v24  ;;  %v498_v30 = vsel %vm497_vm2, %v494_v17, %v496_v25  ;;  %v2191_v25 = vld [vmem:[#allocation7 + $0x10] ss:$0 sm:$0xff] }
 0x1a2   : > { %v511_v31 = vmul.f32 %v2129_v22, %v498_v30  ;;  %v530_v32 = vmul.f32 %v2131_v23, %v517_v29 }
 0x1a4   : > { %v534_v34 = vpop.permute.xlu1 %533  ;;  %v532_v35 = vpop.permute.xlu0 %531  ;;  %v1173_v36 = vpack.c.bf16 %v530_v32, %v511_v31 }
 0x1a5   : > { %v536_v43 = vsel %vm535_vm3, %v532_v35, %v534_v34  ;;  %v539_v44 = vsel %vm535_vm3, 0.0, %v532_v35 }
 0x1a6   : > { %1174 = vmatprep.subr.bf16.mxu0 %v1173_v36  ;;  %v548_v53 = vmul.f32 %v2143_v38, %v539_v44  ;;  %v549_v54 = vmul.f32 %v2145_v40, %v536_v43 }
 0x1a7   : > { %1176 = vmatpush1.bf16.msra.mxu0 %v1175_v39 }
 0x1a8   : > { %v553_v45 = vpop.permute.xlu1 %552  ;;  %v551_v46 = vpop.permute.xlu0 %550 }
 0x1a9   : > { %v555_v49 = vsel %vm554_vm4, %v551_v46, %v553_v45  ;;  %v558_v50 = vsel %vm554_vm4, 0.0, %v551_v46 }
 0x1aa   : > { %v567_v55 = vmul.f32 %v2148_v41, %v558_v50  ;;  %v568_v56 = vmul.f32 %v2150_v42, %v555_v49  ;;  %v935_v50 = vld [vmem:[#allocation14] sm:$0xf] }
 0x1ac   : > { %v570_v57 = vpop.permute.xlu1 %569  ;;  %v572_v58 = vpop.permute.xlu0 %571  ;;  %v1177_v59 = vpack.c.bf16 %v568_v56, %v549_v54  ;;  %v1179_v60 = vpack.c.bf16 %v567_v55, %v548_v53 }
 0x1ad   : > { %v574_v61 = vsel %vm573_vm5, %v570_v57, %v572_v58  ;;  %v577_v62 = vsel %vm573_vm5, %v572_v58, 0.0 }
 0x1ae   : > { %v586_v0 = vmul.f32 %v2155_v47, %v574_v61  ;;  %v587_v1 = vmul.f32 %v2157_v48, %v577_v62  ;;  %1178 = vmatprep.subr.bf16.mxu0 %v1177_v59 }
 0x1af   : > { %1180 = vmatpush1.bf16.msra.mxu0 %v1179_v60 }
 0x1b0   : > { %v610_v3 = vpop.permute.xlu1 %609  ;;  %v591_v6 = vpop.permute.xlu0 %590  ;;  %v1181_v7 = vpack.c.bf16 %v587_v1, %v2085_v5  ;;  %v1183_v8 = vpack.c.bf16 %v586_v0, %v2078_v4 }
 0x1b1   : > { %v615_v9 = vsel %vm611_vm6, %v610_v3, 0.0  ;;  %v596_v10 = vsel %vm592_vm7, %v591_v6, 0.0 }
 0x1b2   : > { %v625_v11 = vmul.f32 %v2169_v63, %v615_v9  ;;  %v606_v12 = vmul.f32 %v2173_v2, %v596_v10  ;;  %1182 = vmatprep.subr.bf16.mxu0 %v1181_v7 }
 0x1b3   : > { %1184 = vmatpush1.bf16.msra.mxu0 %v1183_v8 }
 0x1b4   : > { %v608_v16 = vpop.permute.xlu1 %607  ;;  %v589_v5 = vpop.permute.xlu0 %588  ;;  %v1185_v17 = vpack.c.bf16 %v625_v11, %v606_v12 }
 0x1b5   : > { %v612_v4 = vsel %vm611_vm6, %v608_v16, %v610_v3  ;;  %v593_v20 = vsel %vm592_vm7, %v589_v5, %v591_v6 }
 0x1b6   : > { %v624_v21 = vmul.f32 %v2182_v13, %v612_v4  ;;  %v605_v24 = vmul.f32 %v2185_v15, %v593_v20  ;;  %1186 = vmatprep.subr.bf16.mxu0 %v1185_v17 }
 0x1b8   : > { %v627_v14 = vpop.permute.xlu1 %626  ;;  %v629_v27 = vpop.permute.xlu0 %628  ;;  %v1187_v28 = vpack.c.bf16 %v624_v21, %v605_v24 }
 0x1b9   : > { %v631_v29 = vsel %vm630_vm8, %v627_v14, %v629_v27  ;;  %v634_v30 = vsel %vm630_vm8, %v629_v27, 0.0 }
 0x1ba   : > { %v643_v31 = vmul.f32 %v2191_v25, %v631_v29  ;;  %v644_v32 = vmul.f32 %v2193_v26, %v634_v30  ;;  %1188 = vmatpush1.bf16.msra.mxu0 %v1187_v28 }
 0x1bc   : > { %666 = vmatprep.subr.mxu0 %v644_v32 }
 0x1be   : > { %667 = vmatpush1.msra.mxu0 %v643_v31 }
 0x1bf   : > { %1161 = vmatmul.mubr.msk.f32.vlgmr.msra.gmra.mrb[0].mxu0 %vm646_vm9, %v645_v33 }
 0x1c9   : > { %v725_v34 = vpop.permute.xlu0 %724  ;;  %v733_v36 = vpop.permute.xlu1 %732 }
 0x292   : > { %v716_v35 = vpop.f32.mrb[0].mxu0 }
 0x293   : > { %v727_v37 = vmul.f32 %v725_v34, %v716_v35  ;;  %v718_v39 = vpop.f32.mrb[1].mxu0 }
 0x294   : > { %v728_v43 = vmul.f32 %v725_v34, %v718_v39 }
 0x295   : > { %v735_v44 = vadd.f32 %v733_v36, %v727_v37 }
 0x296   : > { %v736_v45 = vadd.f32 %v733_v36, %v728_v43 }
 0x297   : > { %v2199_v46 = vmax.f32 %v735_v44, 0.0 }
 0x298   : > { %v2205_v49 = vmax.f32 %v736_v45, 0.0 }
 0x299   : > { %801 = vrot.lane.b32.xlu0 %v2199_v46, %s1695_s23  ;;  %751 = vrot.lane.b32.xlu1 %v2199_v46, %s1690_s21 }
 0x29d   : > { %771 = vrot.lane.b32.xlu1 %v2199_v46, %s1693_s13  ;;  %753 = vrot.lane.b32.xlu0 %v2205_v49, %s1690_s21  ;;  %s1591_s21 = scalar_lea.vmem %s2286_s25, 128 }
 0x29e   : > { %p1592_p6 = scmp.ne.s32.totalorder %s2286_s25, %s1591_s21 }
 0x2a0   : > { %p1593_p5 = pnand %p1592_p6, %p2373_p10 }
 0x2a1   : > { %741 = vrot.lane.b32.xlu1 %v2199_v46, %s1691_s6  ;;  %773 = vrot.lane.b32.xlu0 %v2205_v49, %s1693_s13 }
 0x2a2   : > { %p1594_p9 = pneg %p1593_p5 }
 0x2a5   : > { %761 = vrot.lane.b32.xlu1 %v2199_v46, %s1692_s20  ;;  %743 = vrot.lane.b32.xlu0 %v2205_v49, %s1691_s6  ;;  %s1597_s6 = scalar_lea.vmem %s1596_s4, 256 }
 0x2a6   : > { %p1599_p7 = scmp.lt.s32.totalorder %s1597_s6, %s1591_s21 }
 0x2a8   : > { %p1600_p11 = por %p1599_p7, %p1598_p0 }
 0x2a9   : > { %781 = vrot.lane.b32.xlu1 %v2199_v46, %s1694_s3  ;;  %763 = vrot.lane.b32.xlu0 %v2205_v49, %s1692_s20 }
 0x2aa   : > { %p1601_p8 = pnand %p1600_p11, %p1594_p9 }
 0x2ad   : > { %783 = vrot.lane.b32.xlu1 %v2205_v49, %s1694_s3  ;;  %803 = vrot.lane.b32.xlu0 %v2205_v49, %s1695_s23 }
 0x2b1   : > { %793 = vrot.lane.b32.xlu1 %v2205_v49, %s1696_s5  ;;  %791 = vrot.lane.b32.xlu0 %v2199_v46, %s1696_s5 }
 0x2b5   : > { %813 = vrot.lane.b32.xlu1 %v2205_v49, %s1699_s22  ;;  %811 = vrot.lane.b32.xlu0 %v2199_v46, %s1699_s22 }
 0x2b9   : > { %938 = vperm.xlu1 %1332, %v935_v50   ;;  %946 = vperm.xlu0 %1331, %v943_v51  }
 0x30b   : > { %v802_v52 = vpop.permute.xlu0 %801  ;;  %v752_v53 = vpop.permute.xlu1 %751 }
 0x30c   : > { %v758_v0 = vsel %vm516_vm1, 0.0, %v752_v53 }
 0x30d   : > { %v759_v9 = vmul.f32 %v758_v0, %v2122_v18 }
 0x30f   : > { %v772_v54 = vpop.permute.xlu1 %771  ;;  %v754_v55 = vpop.permute.xlu0 %753 }
 0x310   : > { %v778_v58 = vsel %vm554_vm4, 0.0, %v772_v54  ;;  %v755_v59 = vsel %vm516_vm1, %v752_v53, %v754_v55 }
 0x311   : > { %v779_v6 = vmul.f32 %v778_v58, %v2148_v41  ;;  %v760_v7 = vmul.f32 %v755_v59, %v2131_v23  ;;  %v853_v59 = vld [vmem:[#allocation13] sm:$0xf] }
 0x313   : > { %v742_v56 = vpop.permute.xlu1 %741  ;;  %v774_v57 = vpop.permute.xlu0 %773  ;;  %v829_v4 = vrot.slane %v779_v6, 4  ;;  %v824_v20 = vrot.slane %v760_v7, 4 }
 0x314   : > { %v775_v60 = vsel %vm554_vm4, %v772_v54, %v774_v57  ;;  %v748_v10 = vsel %vm497_vm2, 0.0, %v742_v56 }
 0x315   : > { %v780_v8 = vmul.f32 %v775_v60, %v2150_v42  ;;  %v749_v23 = vmul.f32 %v748_v10, %v2125_v19  ;;  %v823_v42 = vrot.slane %v759_v9, 4 }
 0x317   : > { %v762_v61 = vpop.permute.xlu1 %761  ;;  %v744_v62 = vpop.permute.xlu0 %743  ;;  %v830_v21 = vrot.slane %v780_v8, 4  ;;  %v845_v34 = vsel %vm488_vm0, %v749_v23, %v823_v42 }
 0x318   : > { %v768_v1 = vsel %vm535_vm3, 0.0, %v762_v61  ;;  %v745_v3 = vsel %vm497_vm2, %v742_v56, %v744_v62 }
 0x319   : > { %v769_v11 = vmul.f32 %v768_v1, %v2143_v38  ;;  %v750_v12 = vmul.f32 %v745_v3, %v2129_v22 }
 0x31b   : > { %v782_v16 = vpop.permute.xlu1 %781  ;;  %v764_v5 = vpop.permute.xlu0 %763  ;;  %v846_v14 = vsel %vm488_vm0, %v750_v12, %v824_v20  ;;  %v847_v22 = vsel %vm488_vm0, %v769_v11, %v829_v4 }
 0x31c   : > { %v765_v17 = vsel %vm535_vm3, %v762_v61, %v764_v5  ;;  %v1191_v39 = vpack.c.bf16 %v847_v22, %v845_v34 }
 0x31d   : > { %v770_v41 = vmul.f32 %v765_v17, %v2145_v40 }
 0x31f   : > { %v784_v24 = vpop.permute.xlu1 %783  ;;  %v804_v18 = vpop.permute.xlu0 %803  ;;  %v848_v38 = vsel %vm488_vm0, %v770_v41, %v830_v21 }
 0x320   : > { %v785_v27 = vsel %vm573_vm5, %v782_v16, %v784_v24  ;;  %v788_v28 = vsel %vm573_vm5, %v784_v24, 0.0  ;;  %v805_v29 = vsel %vm611_vm6, %v802_v52, %v804_v18  ;;  %v808_v30 = vsel %vm611_vm6, %v804_v18, 0.0 }
 0x321   : > { %v789_v40 = vmul.f32 %v785_v27, %v2155_v47  ;;  %v790_v19 = vmul.f32 %v788_v28, %v2157_v48  ;;  %v809_v31 = vmul.f32 %v805_v29, %v2182_v13  ;;  %v810_v32 = vmul.f32 %v808_v30, %v2169_v63 }
 0x322   : > { %v1189_v33 = vpack.c.bf16 %v848_v38, %v846_v14 }
 0x323   : > { %v835_v35 = vrot.slane %v789_v40, 4  ;;  %v836_v36 = vrot.slane %v790_v19, 4  ;;  %v794_v37 = vpop.permute.xlu1 %793  ;;  %v792_v43 = vpop.permute.xlu0 %791  ;;  %v841_v47 = vrot.slane %v809_v31, 4  ;;  %v842_v50 = vrot.slane %v810_v32, 4 }
 0x324   : > { %1190 = vmatprep.subr.bf16.mxu1 %v1189_v33  ;;  %v798_v44 = vsel %vm592_vm7, %v794_v37, 0.0  ;;  %v795_v45 = vsel %vm592_vm7, %v792_v43, %v794_v37 }
 0x325   : > { %v800_v48 = vmul.f32 %v798_v44, %v2173_v2  ;;  %1192 = vmatpush1.bf16.msra.mxu1 %v1191_v39  ;;  %v799_v63 = vmul.f32 %v795_v45, %v2185_v15  ;;  %v850_v52 = vsel %vm488_vm0, %v2205_v49, %v836_v36  ;;  %v849_v54 = vsel %vm488_vm0, %v2199_v46, %v835_v35 }
 0x327   : > { %v814_v13 = vpop.permute.xlu1 %813  ;;  %v812_v51 = vpop.permute.xlu0 %811  ;;  %v852_v53 = vsel %vm488_vm0, %v800_v48, %v842_v50  ;;  %v851_v55 = vsel %vm488_vm0, %v799_v63, %v841_v47 }
 0x328   : > { %v818_v56 = vsel %vm630_vm8, %v814_v13, 0.0  ;;  %v1193_v57 = vpack.c.bf16 %v852_v53, %v850_v52  ;;  %v1195_v58 = vpack.c.bf16 %v851_v55, %v849_v54  ;;  %v815_v15 = vsel %vm630_vm8, %v812_v51, %v814_v13 }
 0x329   : > { %v820_v2 = vmul.f32 %v2193_v26, %v818_v56  ;;  %v819_v49 = vmul.f32 %v2191_v25, %v815_v15 }
 0x32a   : > { %1194 = vmatprep.subr.bf16.mxu1 %v1193_v57 }
 0x32b   : > { %1196 = vmatpush1.bf16.msra.mxu1 %v1195_v58 }
 0x32c   : > { %1162 = vmatprep.subr.msk.mxu1 %vm488_vm0, %v820_v2 }
 0x32f   : > { %1163 = vmatpush1.msk.msra.mxu1 %vm488_vm0, %v819_v49 }
 0x330   : > { %1164 = vmatmul.mubr.msk.f32.vlgmr.msra.gmra.mrb[0].mxu1 %vm854_vm10, %v853_v59 }
 0x338   : > { %v939_v46 = vpop.permute.xlu1 %938  ;;  %v947_v62 = vpop.permute.xlu0 %946 }
 0x403   : > { %v930_v60 = vpop.f32.mrb[0].mxu1 }
 0x404   : > { %v941_v61 = vmul.f32 %v939_v46, %v930_v60  ;;  %v932_v26 = vpop.f32.mrb[1].mxu1 }
 0x405   : > { %v942_v0 = vmul.f32 %v939_v46, %v932_v26 }
 0x406   : > { %v949_v1 = vadd.f32 %v947_v62, %v941_v61 }
 0x407   : > { %v950_v3 = vadd.f32 %v947_v62, %v942_v0 }
 0x408   : > { %v951_v6 = vmax.f32 %v949_v1, 0.0 }
 0x409   : > { %v952_v25 = vmax.f32 %v950_v3, 0.0 }
 0x40b   : > { %v955_v7 = vcombine.low %v951_v6, %v952_v25 }
 0x40d   : > { %957 = vst [vmem:[%s475_s28] sm:$0xff] %v955_v7 }
 0x40e   : > { %1604 = shalt.err (!%p1601_p8)
}
 0x40f   : > { %s1605_s2 = scalar_lea.hbm %s2284_s27, 128  ;;  %s1609_s3 = scalar_lea.hbm %s2372_s16, 256 }
 0x410   : > { %p1606_p4 = scmp.ne.s32.totalorder %s2284_s27, %s1605_s2  ;;  %p1610_p1 = scmp.lt.u32.totalorder %s2284_s27, %s2372_s16 }
 0x411   : > { %p1611_p3 = scmp.lt.u32.totalorder %s1609_s3, %s1605_s2  ;;  %p1613_p6 = scmp.lt.u32.totalorder %s1605_s2, %s2284_s27 }
 0x412   : > { %p1607_p12 = pnand %p1606_p4, %p2373_p10 }
 0x413   : > { %p1612_p2 = por %p1611_p3, %p1610_p1 }
 0x414   : > { %p1608_p13 = pneg %p1607_p12 }
 0x415   : > { %p1614_p5 = por %p1613_p6, %p1612_p2 }
 0x417   : > { %p1615_p9 = pnand %p1614_p5, %p1608_p13 }
 0x419   : > { %1618 = shalt.err (!%p1615_p9)
}
 0x41a   : > { %1229 = dma.vmem_to_hbm [thread:$0]  (%p2373_p10), %s2286_s25, 128, %s2284_s27, %s959_s24  }
 0x41b PF: > { %s985_s22 = sand.u32 1, %s1665_s30   ;;  %p2374_p0 = scmp.ne.s32.totalorder %s2360_s17, 0 }
 0x41c   : > { %p2375_p7 = scmp.ge.s32.totalorder %s1677_s12, 2  ;;  %s986_s26 = scalar_lea.sflag [#allocation4], %s985_s22 }
 0x41e   : > { %p1261_p11 = pnand %p2375_p7, %p2374_p0 }
 0x420   : > { %1660 = dma.done.wait (!%p1261_p11), %s986_s26, 128  }
 0x421   : > { %1662 = vsyncadd (!%p1261_p11), %s986_s26, 4294967168  ;;  %p28_p8 = scmp.ge.s32.totalorder %s1945_s19, 4   ;;  %s2376_s30 = smov %s1669_s10 }
 0x422   : > { %s2377_s10 = smov %s1673_s11  ;;  %s2378_s11 = smov %s1957_s18 }
 0x423   : > { %s2379_s12 = smov %s1945_s19  ;;  %30 = sbr.rel (!%p28_p8) target bundleno = 17 (0x11), region = 142 }
 0x42a   :  { %991 = vsyncpa [#allocation3], 1 }
 0x42b   :  { %993 = vsyncpa [#allocation3 + $0x1], 1 }
 0x42c   :  { %994 = vsyncpa [#allocation6], 1 }
 0x42d   :  { %996 = vsyncpa [#allocation6 + $0x1], 1 }
 0x42e   :  { %997 = vsyncpa [#allocation9], 1 }
 0x42f   :  { %998 = vsyncpa [#allocation12], 1 }
 0x430   :  { %999 = vsyncpa [#allocation15], 1 }
 0x431   :  { %1000 = vsyncpa [#allocation4], 1 }
 0x432   :  { %1002 = vsyncpa [#allocation4 + $0x1], 1 }

</bundles_post_ra>
